<compile_context>
chip_gen: v7x
topology: tpu7x:2x2x1
jax: 0.10.0
libtpu: 0.0.40
codegen_flags: <defaults>
</compile_context>

<pallas_src>
import jax
import jax.numpy as jnp
from jax.experimental import pallas as pl
from jax.experimental.pallas import tpu as pltpu


def _round_up(x: int, m: int) -> int:
    return ((x + m - 1) // m) * m


def _pick_divisor_tile(dim_padded: int, t_max: int, align: int) -> int:
    """Largest multiple of `align` that divides dim_padded and is <= t_max."""
    t = (min(t_max, dim_padded) // align) * align
    t = max(t, align)
    while dim_padded % t:
        t -= align
    return t


def _fc_kernel_acc(x_ref, w_ref, b_ref, o_ref, acc_ref):
    """Multi-K-step tile: f32 VMEM accumulator, bias added in finalize."""
    k = pl.program_id(2)

    @pl.when(k == 0)
    def _init():
        acc_ref[...] = jnp.zeros_like(acc_ref)

    acc_ref[...] += jnp.dot(
        x_ref[...], w_ref[...], preferred_element_type=jnp.float32
    )

    @pl.when(k == pl.num_programs(2) - 1)
    def _finalize():
        out = acc_ref[...] + b_ref[...].astype(jnp.float32)
        o_ref[...] = out.astype(o_ref.dtype)


def _fc_kernel_single_k(x_ref, w_ref, b_ref, o_ref):
    """Single-K-step tile: no accumulator scratch, write dot + bias directly."""
    acc = jnp.dot(x_ref[...], w_ref[...], preferred_element_type=jnp.float32)
    o_ref[...] = (acc + b_ref[...].astype(jnp.float32)).astype(o_ref.dtype)


class FcPallas:
    """Pallas TPU equivalent of FcModule: y = x @ W^T + b.

    Init does the one-time parameter prep (transpose / cast / pad); __call__
    only pads the activations and launches the tiled kernel.
    """

    def __init__(self, weight, bias, *, param_dtype=None,
                 tm_max=256, tn_max=512, tk_max=2048):
        d_intr, d_in = weight.shape
        assert bias.shape == (d_intr,)
        self.d_in, self.d_intr = d_in, d_intr
        self.tm_max = tm_max
        self.param_dtype = jnp.dtype(param_dtype if param_dtype is not None
                                     else weight.dtype)

        Kp = _round_up(d_in, 128)
        Np = _round_up(d_intr, 128)
        self.Kp, self.Np = Kp, Np
        self.tk = _pick_divisor_tile(Kp, tk_max, 128)
        self.tn = _pick_divisor_tile(Np, tn_max, 128)

        # One-time prep (NOT in the per-call path): transpose to (d_in, d_intr)
        # so the kernel is a plain MK x KN dot, cast, zero-pad K/N.
        w_t = jnp.asarray(weight).T.astype(self.param_dtype)
        self.w_t = jnp.pad(w_t, ((0, Kp - d_in), (0, Np - d_intr)))
        b32 = jnp.asarray(bias).astype(jnp.float32)
        self.b = jnp.pad(b32, (0, Np - d_intr)).reshape(1, Np)

    def __call__(self, x):
        B, d_in = x.shape
        assert d_in == self.d_in, "x feature dim must match weight"
        out_dtype = x.dtype
        Kp, Np, tk = self.Kp, self.Np, self.tk
        tn = self.tn

        # Adaptive tm: fewest <=tm_max blocks covering B, rounded up to 8,
        # so padded output rows stay minimal.
        n_m = max(1, -(-B // self.tm_max))
        tm = _round_up(-(-B // n_m), 8)
        Mp = tm * n_m

        # v7x has 2 TensorCores: if the M grid is a single block, split N so
        # both cores get work (needs Np >= 256 to keep lane-dense 128 tiles).
        if n_m == 1 and Np // tn < 2 and Np >= 256:
            tn = _pick_divisor_tile(Np, Np // 2, 128)
        n_n = Np // tn
        n_k = Kp // tk

        # Per-call activation prep only (cheap): cast + zero-pad.
        xp = x.astype(self.param_dtype)
        if (Mp, Kp) != (B, d_in):
            xp = jnp.pad(xp, ((0, Mp - B), (0, Kp - d_in)))

        # VMEM budget: double-buffered x/w/bias/out tiles + f32 accumulator.
        p_bytes = self.param_dtype.itemsize
        o_bytes = jnp.dtype(out_dtype).itemsize
        need = (2 * (tm * tk + tk * tn) * p_bytes
                + 2 * tm * tn * o_bytes
                + 2 * tn * 4
                + tm * tn * 4)
        vmem_limit = min(max(int(need * 1.25) + (2 << 20), 8 << 20), 48 << 20)

        if n_k == 1:
            kernel = _fc_kernel_single_k
            scratch = []
        else:
            kernel = _fc_kernel_acc
            scratch = [pltpu.VMEM((tm, tn), jnp.float32)]

        out = pl.pallas_call(
            kernel,
            out_shape=jax.ShapeDtypeStruct((Mp, Np), out_dtype),
            grid=(n_m, n_n, n_k),
            in_specs=[
                pl.BlockSpec((tm, tk), lambda i, j, k: (i, k)),   # x tile
                pl.BlockSpec((tk, tn), lambda i, j, k: (k, j)),   # W^T tile
                pl.BlockSpec((1, tn), lambda i, j, k: (0, j)),    # bias tile
            ],
            out_specs=pl.BlockSpec((tm, tn), lambda i, j, k: (i, j)),
            scratch_shapes=scratch,
            compiler_params=pltpu.CompilerParams(
                dimension_semantics=("parallel", "parallel", "arbitrary"),
                vmem_limit_bytes=vmem_limit,
            ),
        )(xp, self.w_t, self.b)

        if (Mp, Np) != (B, self.d_intr):
            out = out[:B, :self.d_intr]
        return out


if __name__ == "__main__":
    key = jax.random.PRNGKey(0)
    kx, kw, kb, kx2, kw2, kb2, kx3, kw3, kb3 = jax.random.split(key, 9)

    # --- Case 1: aligned, multi-tile, single K step (fast path), megacore N split.
    batch, d_in, d_intr = 256, 1024, 512
    bound = 1.0 / (d_in ** 0.5)
    weight = jax.random.uniform(kw, (d_intr, d_in), jnp.float32, -bound, bound)
    bias = jax.random.uniform(kb, (d_intr,), jnp.float32, -bound, bound)
    x = jax.random.normal(kx, (batch, d_in), jnp.float32)

    fc = FcPallas(weight, bias)
    y = fc(x)
    jax.block_until_ready(y)
    y_ref = x @ weight.T + bias
    assert y.shape == (batch, d_intr)
    assert jnp.allclose(y, y_ref, atol=2e-4, rtol=1e-4), "mismatch (aligned)"

    # --- Case 2: tiny unaligned sizes (original-module scale): exercises padding.
    b2, di2, dh2 = 8, 32, 16
    bound2 = 1.0 / (di2 ** 0.5)
    weight2 = jax.random.uniform(kw2, (dh2, di2), jnp.float32, -bound2, bound2)
    bias2 = jax.random.uniform(kb2, (dh2,), jnp.float32, -bound2, bound2)
    x2 = jax.random.normal(kx2, (b2, di2), jnp.float32)

    fc2 = FcPallas(weight2, bias2)
    y2 = fc2(x2)
    jax.block_until_ready(y2)
    y2_ref = x2 @ weight2.T + bias2
    assert y2.shape == (b2, dh2)
    assert jnp.allclose(y2, y2_ref, atol=1e-5, rtol=1e-5), "mismatch (tiny)"

    # --- Case 3: ragged batch + multi-K accumulation + unaligned d_intr.
    b3, di3, dh3 = 300, 1024, 200
    bound3 = 1.0 / (di3 ** 0.5)
    weight3 = jax.random.uniform(kw3, (dh3, di3), jnp.float32, -bound3, bound3)
    bias3 = jax.random.uniform(kb3, (dh3,), jnp.float32, -bound3, bound3)
    x3 = jax.random.normal(kx3, (b3, di3), jnp.float32)

    fc3 = FcPallas(weight3, bias3, tm_max=128, tk_max=512)  # force K grid > 1
    y3 = fc3(x3)
    jax.block_until_ready(y3)
    y3_ref = x3 @ weight3.T + bias3
    assert y3.shape == (b3, dh3)
    assert jnp.allclose(y3, y3_ref, atol=2e-4, rtol=1e-4), "mismatch (ragged/acc)"

    # --- Case 4: bf16 parameter/activation path with f32 accumulation.
    fc_bf16 = FcPallas(weight, bias, param_dtype=jnp.bfloat16)
    y4 = fc_bf16(x)
    jax.block_until_ready(y4)
    x_q = x.astype(jnp.bfloat16).astype(jnp.float32)
    w_q = weight.astype(jnp.bfloat16).astype(jnp.float32)
    y4_ref = x_q @ w_q.T + bias
    assert y4.shape == (batch, d_intr)
    assert jnp.allclose(y4, y4_ref, atol=2e-3, rtol=2e-3), "mismatch (bf16)"

    print("KERNEL_OK")
</pallas_src>

<mosaic_0001>
module attributes {stable_mosaic.version = 11 : i64} {
  func.func @_fc_kernel_single_k(%arg0: i32, %arg1: i32, %arg2: i32, %arg3: memref<256x1024xf32, #tpu.memory_space<vmem>>, %arg4: memref<1024x256xf32, #tpu.memory_space<vmem>>, %arg5: memref<1x256xf32, #tpu.memory_space<vmem>>, %arg6: memref<256x256xf32, #tpu.memory_space<vmem>>) attributes {dimension_semantics = [#tpu.dimension_semantics<parallel>, #tpu.dimension_semantics<parallel>, #tpu.dimension_semantics<arbitrary>], iteration_bounds = array<i64: 1, 2, 1>, scalar_prefetch = 0 : i64, scratch_operands = 0 : i64, tpu.core_type = #tpu.core_type<tc>, window_params = [{transform_indices = @transform_0, window_bounds = array<i64: 256, 1024>}, {transform_indices = @transform_1, window_bounds = array<i64: 1024, 256>}, {transform_indices = @transform_2, window_bounds = array<i64: 1, 256>}, {transform_indices = @transform_3, window_bounds = array<i64: 256, 256>}]} {
    %c0 = arith.constant 0 : index
    %c0_0 = arith.constant 0 : index
    %0 = vector.load %arg3[%c0, %c0_0] : memref<256x1024xf32, #tpu.memory_space<vmem>>, vector<256x1024xf32>
    %c0_1 = arith.constant 0 : index
    %c0_2 = arith.constant 0 : index
    %1 = vector.load %arg4[%c0_1, %c0_2] : memref<1024x256xf32, #tpu.memory_space<vmem>>, vector<1024x256xf32>
    %cst = arith.constant dense<0.000000e+00> : vector<256x256xf32>
    %2 = tpu.matmul %0, %1, %cst {dimension_numbers = #tpu.dot_dimension_numbers<[1], [0], [0], [1], [0, 0, 1, 1], [], []>} : vector<256x1024xf32>, vector<1024x256xf32>, vector<256x256xf32> -> vector<256x256xf32>
    %c0_3 = arith.constant 0 : index
    %c0_4 = arith.constant 0 : index
    %3 = vector.load %arg5[%c0_3, %c0_4] : memref<1x256xf32, #tpu.memory_space<vmem>>, vector<1x256xf32>
    %4 = vector.broadcast %3 : vector<1x256xf32> to vector<256x256xf32>
    %5 = arith.addf %2, %4 : vector<256x256xf32>
    %c0_5 = arith.constant 0 : index
    %c0_6 = arith.constant 0 : index
    %6 = vector.load %arg6[%c0_5, %c0_6] : memref<256x256xf32, #tpu.memory_space<vmem>>, vector<256x256xf32>
    tpu.vector_store %arg6[%c0_5, %c0_6], %5 {strides = array<i32>} : memref<256x256xf32, #tpu.memory_space<vmem>>, vector<256x256xf32>,
    return
  }
  func.func @transform_0(%arg0: i32, %arg1: i32, %arg2: i32) -> (i32, i32) {
    %c0_i32 = arith.constant 0 : i32
    return %arg0, %arg2 : i32, i32
  }
  func.func @transform_1(%arg0: i32, %arg1: i32, %arg2: i32) -> (i32, i32) {
    %c0_i32 = arith.constant 0 : i32
    return %arg2, %arg1 : i32, i32
  }
  func.func @transform_2(%arg0: i32, %arg1: i32, %arg2: i32) -> (i32, i32) {
    %c0_i32 = arith.constant 0 : i32
    %c0_i32_0 = arith.constant 0 : i32
    return %c0_i32, %arg1 : i32, i32
  }
  func.func @transform_3(%arg0: i32, %arg1: i32, %arg2: i32) -> (i32, i32) {
    %c0_i32 = arith.constant 0 : i32
    return %arg0, %arg1 : i32, i32
  }
}

</mosaic_0001>

<bundles_post_ra>
// kernel: tpu_custom_call.1
= control target key start
LH: loop header
LB: loop body
LE: loop exit
PB: predicated region body
PF: predicated region fallthrough
CT: control target
= control target key end

     0   :  { %s3527_s0 = inlined_call_operand.hbm [shape: f32[256,1024], index: 0, kind: input, shape index: {}]   ;;  %s3528_s1 = inlined_call_operand.hbm [shape: f32[1024,512], index: 1, kind: input, shape index: {}]   ;;  %s3529_s2 = inlined_call_operand.hbm [shape: f32[1,512], index: 2, kind: input, shape index: {}]   ;;  %s3530_s3 = inlined_call_operand.hbm [shape: f32[256,512], index: 3, kind: output, shape index: {}]  }
   0x1   :  { %3539 = sst [smem:[#allocation13_spill]] %s3528_s1 }
   0x2   :  { %8 = vsyncpa [#allocation3], 0 }
   0x3   :  { %9 = vsyncpa [#allocation6], 0 }
   0x4   :  { %11 = vsyncpa [#allocation6 + $0x1], 0 }
   0x5   :  { %12 = vsyncpa [#allocation4], 0 }
   0x6   :  { %14 = vsyncpa [#allocation4 + $0x1], 0  ;;  %s2875_s12 = smov 0   ;;  %s2877_s13 = smov 0  }
   0x7   :  { %s2879_s14 = smov 0   ;;  %s2881_s15 = smov 0  }
   0x8   :  { %s2883_s16 = smov 0   ;;  %s2885_s17 = smov 0  }
   0x9 LB: > { %s35_s18 = sadd.s32 1, %s2837_s16  ;;  %s76_s19 = sadd.s32 1, %s2829_s14  ;;  %s2841_s17 = sphi %s2885_s17, %s20_s17   ;;  %s2837_s16 = sphi %s2883_s16, %s3563_s16   ;;  %s2833_s15 = sphi %s2881_s15, %s3562_s15   ;;  %s2829_s14 = sphi %s2879_s14, %s3561_s14   ;;  %s2825_s13 = sphi %s2877_s13, %s3560_s13   ;;  %s2821_s12 = sphi %s2875_s12, %s3559_s12  }
   0xa   : > { %p37_p0 = scmp.ge.s32.totalorder %s35_s18, 2  ;;  %p83_p1 = scmp.ne.s32.totalorder %s2829_s14, %s2825_s13 }
   0xb   : > { %p84_p2 = scmp.eq.s32.totalorder %s2841_s17, 0  ;;  %p2607_p5 = scmp.lt.s32.totalorder %s2841_s17, 2 }
   0xc   : > { %s3565_s18 = smov (%p37_p0, %s35_s18), 0  ;;  %s186_s21 = sand.u32 1, %s2841_s17  }
   0xd   : > { %3540 = sst [smem:[#allocation12_spill]] %s3565_s18  ;;  %p85_p4 = por %p84_p2, %p83_p1 }
   0xe   : > { %s72_s20 = ssub.s32 %s2837_s16, %s3565_s18  ;;  %s188_s22 = sand.u32 1, %s2829_s14  }
   0xf   : > { %p74_p6 = scmp.eq.s32.totalorder %s72_s20, 0  ;;  %s2066_s23 = sshll.u32 %s2837_s16, 8 }
  0x10   : > { %s2050_s25 = sshll.u32 %s188_s22, 11  ;;  %s3541_s1 = sld [smem:[#allocation13_spill]] }
  0x11   : > { %s2923_s24 = scalar_select %p74_p6, %s2829_s14, %s76_s19  }
  0x12   : > { %p2932_p7 = pnand %p2607_p5, %p85_p4  ;;  %s190_s30 = scalar_lea.vmem [#allocation5], %s2050_s25 }
  0x13   : > { %s200_s4 = sshll.u32 %s190_s30, 4  ;;  %s2938_s5 = scalar_lea.sflag [#allocation6], %s186_s21  ;;  %s2936_s4 = int_to_ptr.vmem [resolvable:$true] %s200_s4 }
  0x14   : > { %s3542_s29 = scalar_select %p2932_p7, 1, 0 }
  0x15   : > { %p3533_p9 = pneg %p2932_p7 }
  0x16   : > { %s2930_s28 = scalar_lea.hbm %s3541_s1, %s2066_s23  ;;  %s2672_s9 = scalar_lea.hbm %s3541_s1, 65536 }
  0x17   : > { %s2667_s6 = scalar_lea.hbm %s2930_s28, 32768  ;;  %p2673_p12 = scmp.lt.u32.totalorder %s2930_s28, %s3541_s1 }
  0x18   : > { %p2668_p8 = scmp.ne.s32.totalorder %s2930_s28, %s2667_s6  ;;  %p2674_p13 = scmp.lt.u32.totalorder %s2672_s9, %s2667_s6 }
  0x19   : > { %p2676_p2 = scmp.lt.u32.totalorder %s2667_s6, %s2930_s28 }
  0x1a   : > { %p2670_p10 = pnand %p3533_p9, %p2668_p8  ;;  %p2675_p0 = por %p2674_p13, %p2673_p12 }
  0x1c   : > { %p2671_p11 = pneg %p2670_p10  ;;  %p2677_p4 = por %p2676_p2, %p2675_p0 }
  0x1e   : > { %p2678_p5 = pnand %p2677_p4, %p2671_p11 }
  0x20   : > { %2681 = shalt.err (!%p2678_p5)
}
  0x21   : > { %s2682_s19 = scalar_lea.vmem %s2936_s4, 32768  ;;  %s2843_s20 = smov [#allocation5]  }
  0x22   : > { %p2683_p6 = scmp.ne.s32.totalorder %s2936_s4, %s2682_s19  ;;  %s2687_s21 = sshll.u32 %s2843_s20, 4  ;;  %s2688_s21 = int_to_ptr.vmem [resolvable:$false] %s2687_s21 }
  0x23   : > { %s2689_s23 = scalar_lea.vmem %s2688_s21, 65536  ;;  %p2690_p3 = scmp.lt.s32.totalorder %s2936_s4, %s2688_s21 }
  0x24   : > { %p2685_p8 = pnand %p2683_p6, %p3533_p9  ;;  %p2691_p12 = scmp.lt.s32.totalorder %s2689_s23, %s2682_s19 }
  0x26   : > { %p2686_p10 = pneg %p2685_p8  ;;  %p2692_p13 = por %p2691_p12, %p2690_p3 }
  0x28   : > { %p2693_p0 = pnand %p2692_p13, %p2686_p10 }
  0x2a   : > { %2696 = shalt.err (!%p2693_p0)
}
  0x2b   : > { %s2844_s25 = smov 512   ;;  %s2845_s26 = smov 256  }
  0x2c   : > { %s2846_s27 = smov 16   ;;  %s2967_s30 = sadd.s32 4294967295, %s2841_s17  }
  0x2d   : > { %2598 = dma.hbm_to_vmem [thread:$0]  (!%p2932_p7), %s2930_s28, 32768, %s2936_s4, %s2938_s5, %s2844_s25, %s2845_s26, %s2846_s27  }
  0x2e   : > { %s2046_s6 = sadd.s32 4294967294, %s2841_s17   ;;  %p89_p3 = scmp.ne.s32.totalorder %s2825_s13, %s2821_s12 }
  0x2f   : > { %p3532_p11 = scmp.eq.s32.totalorder %s2967_s30, 0  ;;  %p141_p2 = scmp.eq.s32.totalorder %s2967_s30, 1 }
  0x30   : > { %p147_p4 = scmp.eq.s32.totalorder %s2046_s6, 1  ;;  %p2047_p6 = scmp.ge.s32.totalorder %s2841_s17, 1 }
  0x31   : > { %p2976_p5 = por %p3532_p11, %p89_p3  ;;  %p2984_p8 = por %p141_p2, %p83_p1 }
  0x32   : > { %p2988_p10 = por %p147_p4, %p89_p3  ;;  %p154_p12 = scmp.lt.s32.totalorder %s2841_s17, 3 }
  0x33   : > { %s3543_s7 = scalar_select %p2976_p5, 1, 0 }
  0x34   : > { %s3544_s28 = scalar_select %p2984_p8, 1, 0 }
  0x35   : > { %s3545_s4 = scalar_select %p2988_p10, 1, 0 }
  0x36   : > { %p2993_p13 = pnand %p2047_p6, %p154_p12  ;;  %s2847_s9 = smov [#allocation2]  }
  0x37   : > { %s172_s10 = sshll.u32 %s2847_s9, 4  ;;  %s2053_s11 = sshll.u32 %s188_s22, 1  ;;  %s2997_s10 = int_to_ptr.vmem [resolvable:$true] %s172_s10 }
  0x38   : > { %s3546_s8 = scalar_select %p2993_p13, 1, 0 }
  0x39   : > { %p2591_p0 = pneg %p2993_p13  ;;  %s2067_s19 = sshll.u32 %s2837_s16, 5 }
  0x3a   : > { %s3013_s25 = scalar_lea.hbm %s3529_s2, %s2067_s19  ;;  %s214_s26 = scalar_lea.vmem [#allocation7], %s2053_s11 }
  0x3b   : > { %p3006_p1 = pnand %p2591_p0, %p3532_p11  ;;  %s222_s27 = sshll.u32 %s214_s26, 4  ;;  %s3015_s27 = int_to_ptr.vmem [resolvable:$true] %s222_s27 }
  0x3c   : > { %s2697_s22 = scalar_lea.hbm %s3527_s0, 32768 }
  0x3d   : > { %p2698_p3 = scmp.ne.s32.totalorder %s3527_s0, %s2697_s22  ;;  %p2699_p2 = pneg %p3006_p1 }
  0x3e   : > { %p2704_p12 = scmp.lt.u32.totalorder %s2697_s22, %s3527_s0 }
  0x3f   : > { %p2700_p4 = pnand %p2699_p2, %p2698_p3 }
  0x41   : > { %p2701_p6 = pneg %p2700_p4 }
  0x43   : > { %p2706_p0 = pnand %p2704_p12, %p2701_p6 }
  0x45   : > { %2709 = shalt.err (!%p2706_p0)
}
  0x46   : > { %s2710_s11 = scalar_lea.vmem %s2997_s10, 32768  ;;  %p2718_p8 = scmp.lt.s32.totalorder %s2997_s10, %s2997_s10 }
  0x47   : > { %p2711_p11 = scmp.ne.s32.totalorder %s2997_s10, %s2710_s11  ;;  %p2719_p5 = scmp.lt.s32.totalorder %s2710_s11, %s2710_s11 }
  0x49   : > { %p2713_p9 = pnand %p2711_p11, %p2699_p2  ;;  %p2720_p13 = por %p2719_p5, %p2718_p8 }
  0x4b   : > { %p2714_p10 = pneg %p2713_p9 }
  0x4d   : > { %p2721_p7 = pnand %p2720_p13, %p2714_p10 }
  0x4f   : > { %2724 = shalt.err (!%p2721_p7)
}
  0x50   : > { %s2848_s1 = smov 1024   ;;  %s2849_s18 = smov 64  }
  0x51   : > { %2594 = dma.hbm_to_vmem [thread:$0]  (!%p3006_p1), %s3527_s0, 32768, %s2997_s10, [#allocation3], %s2848_s1, %s2848_s1, %s2849_s18  }
  0x52   : > { %s2725_s6 = scalar_lea.hbm %s3013_s25, 32  ;;  %p3548_p11 = scmp.ne.s32.totalorder %s3542_s29, 0 }
  0x53   : > { %p2726_p9 = scmp.ne.s32.totalorder %s3013_s25, %s2725_s6  ;;  %s2730_s21 = scalar_lea.hbm %s3529_s2, 64 }
  0x54   : > { %p3549_p5 = pneg %p3548_p11  ;;  %p2731_p10 = scmp.lt.u32.totalorder %s3013_s25, %s3529_s2 }
  0x55   : > { %p2732_p13 = scmp.lt.u32.totalorder %s2730_s21, %s2725_s6  ;;  %p2734_p2 = scmp.lt.u32.totalorder %s2725_s6, %s3013_s25 }
  0x56   : > { %p2728_p8 = pnand %p2726_p9, %p3549_p5 }
  0x57   : > { %p2733_p3 = por %p2732_p13, %p2731_p10 }
  0x58   : > { %p2729_p7 = pneg %p2728_p8 }
  0x59   : > { %p2735_p4 = por %p2734_p2, %p2733_p3 }
  0x5b   : > { %p2736_p6 = pnand %p2735_p4, %p2729_p7 }
  0x5d   : > { %2739 = shalt.err (!%p2736_p6)
}
  0x5e   : > { %s2740_s10 = scalar_lea.vmem %s3015_s27, 32  ;;  %p3550_p12 = pmov %p3549_p5 }
  0x5f   : > { %p2741_p1 = scmp.ne.s32.totalorder %s3015_s27, %s2740_s10  ;;  %s2850_s20 = smov [#allocation7]  }
  0x60   : > { %s2745_s1 = sshll.u32 %s2850_s20, 4  ;;  %s2746_s1 = int_to_ptr.vmem [resolvable:$false] %s2745_s1 }
  0x61   : > { %p2743_p0 = pnand %p2741_p1, %p3550_p12  ;;  %s2747_s18 = scalar_lea.vmem %s2746_s1, 64 }
  0x62   : > { %p2748_p5 = scmp.lt.s32.totalorder %s3015_s27, %s2746_s1  ;;  %p2749_p8 = scmp.lt.s32.totalorder %s2747_s18, %s2740_s10 }
  0x63   : > { %p2744_p9 = pneg %p2743_p0 }
  0x64   : > { %p2750_p10 = por %p2749_p8, %p2748_p5 }
  0x66   : > { %p2751_p13 = pnand %p2750_p10, %p2744_p9 }
  0x68   : > { %2754 = shalt.err (!%p2751_p13)
}
  0x69   : > { %2601 = dma.hbm_to_vmem [thread:$0]  (!%p3548_p11), %s3013_s25, 32, %s3015_s27, %s2938_s5  }
  0x6a   : > { %p3551_p7 = scmp.ne.s32.totalorder %s3546_s8, 0 }
  0x6b   : > { %p3552_p3 = scmp.eq.s32.totalorder (!%p3551_p7), %s2967_s30, 0 }
  0x6c   : > { %231 = sbr.rel (%p3551_p7) target bundleno = 674 (0x2a2), region = 32 }
  0x73   : > { %2808 = dma.done.wait (%p3552_p3), [#allocation3], 32768   ;;  %p3553_p2 = pmov %p3552_p3 }
  0x74   : > { %s237_s19 = sand.u32 1, %s2967_s30   ;;  %s3070_s26 = sand.u32 1, %s2825_s13  }
  0x75   : > { %2810 = vsyncadd (%p3553_p2), [#allocation3], 4294934528  ;;  %s2058_s29 = sshll.u32 %s3070_s26, 11  ;;  %s238_s6 = scalar_lea.sflag [#allocation6], %s237_s19 }
  0x76   : > { %s3073_s9 = scalar_lea.vmem [#allocation5], %s2058_s29  ;;  %p3554_p11 = scmp.ne.s32.totalorder %s3543_s7, 0 }
  0x78   : > { %2812 = dma.done.wait (%p3554_p11), %s238_s6, 32800  }
  0x79   : > { %2814 = vsyncadd (%p3554_p11), %s238_s6, 4294934496  ;;  %v542_v0 = vld [vmem:[%s3073_s9 + $0x8] sm:$0xff]  ;;  %v544_v1 = vld [vmem:[%s3073_s9 + $0x18] sm:$0xff]  ;;  %s2059_s5 = sshll.u32 %s3070_s26, 1  ;;  %s2060_s7 = sshll.u32 %s3070_s26, 9 }
  0x7a   : > { %v670_v2 = vld [vmem:[%s3073_s9 + $0x408] sm:$0xff]  ;;  %v2069_v3 = vpack.c.bf16 %v544_v1, %v542_v0  ;;  %v672_v4 = vld [vmem:[%s3073_s9 + $0x418] sm:$0xff]  ;;  %v541_v5 = vld [vmem:[%s3073_s9] sm:$0xff]  ;;  %s250_s30 = scalar_lea.vmem [#allocation7], %s2059_s5  ;;  %s3343_s8 = scalar_lea.vmem [#allocation8], %s2060_s7 }
  0x7b   : > { %v543_v6 = vld [vmem:[%s3073_s9 + $0x10] sm:$0xff]  ;;  %v2197_v7 = vpack.c.bf16 %v672_v4, %v670_v2  ;;  %v669_v9 = vld [vmem:[%s3073_s9 + $0x400] sm:$0xff]  ;;  %v546_v11 = vld [vmem:[%s3073_s9 + $0x28] sm:$0xff]  ;;  %s2068_s25 = sshll.u32 %s2833_s15, 8  ;;  %s1918_s27 = sshll.u32 %s3343_s8, 4  ;;  %s3476_s27 = int_to_ptr.vmem [resolvable:$true] %s1918_s27 }
  0x7c   : > { %v2071_v8 = vpack.c.bf16 %v543_v6, %v541_v5  ;;  %v671_v10 = vld [vmem:[%s3073_s9 + $0x410] sm:$0xff]  ;;  %2070 = vmatprep.subr.bf16.mxu1 %v2069_v3  ;;  %v548_v13 = vld [vmem:[%s3073_s9 + $0x38] sm:$0xff]  ;;  %v674_v14 = vld [vmem:[%s3073_s9 + $0x428] sm:$0xff]  ;;  %s3474_s23 = scalar_lea.hbm %s3530_s3, %s2068_s25  ;;  %s1902_s15 = scalar_lea.sflag [#allocation4], %s3070_s26 }
  0x7d   : > { %v2199_v12 = vpack.c.bf16 %v671_v10, %v669_v9  ;;  %v676_v15 = vld [vmem:[%s3073_s9 + $0x438] sm:$0xff]  ;;  %2198 = vmatprep.subr.bf16.mxu0 %v2197_v7  ;;  %v2073_v16 = vpack.c.bf16 %v548_v13, %v546_v11  ;;  %v545_v18 = vld [vmem:[%s3073_s9 + $0x20] sm:$0xff]  ;;  %v547_v19 = vld [vmem:[%s3073_s9 + $0x30] sm:$0xff]  ;;  %s2755_s11 = scalar_lea.vmem %s3476_s27, 8192  ;;  %p3555_p6 = scmp.ne.s32.totalorder %s3544_s28, 0 }
  0x7e   : > { %2072 = vmatpush1.bf16.msra.mxu1 %v2071_v8  ;;  %v2201_v17 = vpack.c.bf16 %v676_v15, %v674_v14  ;;  %v673_v20 = vld [vmem:[%s3073_s9 + $0x420] sm:$0xff]  ;;  %v2075_v21 = vpack.c.bf16 %v547_v19, %v545_v18  ;;  %v675_v22 = vld [vmem:[%s3073_s9 + $0x430] sm:$0xff]  ;;  %v550_v23 = vld [vmem:[%s3073_s9 + $0x48] sm:$0xff]  ;;  %p2756_p4 = scmp.ne.s32.totalorder %s3476_s27, %s2755_s11  ;;  %s2851_s10 = smov [#allocation8]  }
  0x7f   : > { %2200 = vmatpush1.bf16.msra.mxu0 %v2199_v12  ;;  %v552_v24 = vld [vmem:[%s3073_s9 + $0x58] sm:$0xff]  ;;  %2074 = vmatprep.subr.bf16.mxu1 %v2073_v16  ;;  %v2203_v25 = vpack.c.bf16 %v675_v22, %v673_v20  ;;  %v678_v27 = vld [vmem:[%s3073_s9 + $0x448] sm:$0xff]  ;;  %v549_v29 = vld [vmem:[%s3073_s9 + $0x40] sm:$0xff]  ;;  %s2759_s20 = sshll.u32 %s2851_s10, 4  ;;  %s2760_s20 = int_to_ptr.vmem [resolvable:$false] %s2759_s20 }
  0x80   : > { %2202 = vmatprep.subr.bf16.mxu0 %v2201_v17  ;;  %v2077_v26 = vpack.c.bf16 %v552_v24, %v550_v23  ;;  %v680_v28 = vld [vmem:[%s3073_s9 + $0x458] sm:$0xff]  ;;  %v551_v31 = vld [vmem:[%s3073_s9 + $0x50] sm:$0xff]  ;;  %v677_v32 = vld [vmem:[%s3073_s9 + $0x440] sm:$0xff]  ;;  %p2757_p1 = pnand %p2756_p4, %p3555_p6  ;;  %s2761_s1 = scalar_lea.vmem %s2760_s20, 16384 }
  0x81   : > { %v2205_v30 = vpack.c.bf16 %v680_v28, %v678_v27  ;;  %v679_v33 = vld [vmem:[%s3073_s9 + $0x450] sm:$0xff]  ;;  %v2079_v34 = vpack.c.bf16 %v551_v31, %v549_v29  ;;  %v554_v35 = vld [vmem:[%s3073_s9 + $0x68] sm:$0xff]  ;;  %v556_v36 = vld [vmem:[%s3073_s9 + $0x78] sm:$0xff]  ;;  %p2762_p0 = scmp.lt.s32.totalorder %s3476_s27, %s2760_s20  ;;  %p2763_p9 = scmp.lt.s32.totalorder %s2761_s1, %s2755_s11 }
  0x82   : > { %2076 = vmatpush1.bf16.msra.mxu1 %v2075_v21  ;;  %v682_v37 = vld [vmem:[%s3073_s9 + $0x468] sm:$0xff]  ;;  %v2207_v38 = vpack.c.bf16 %v679_v33, %v677_v32  ;;  %v2081_v39 = vpack.c.bf16 %v556_v36, %v554_v35  ;;  %v684_v40 = vld [vmem:[%s3073_s9 + $0x478] sm:$0xff]  ;;  %v553_v41 = vld [vmem:[%s3073_s9 + $0x60] sm:$0xff]  ;;  %p2758_p12 = pneg %p2757_p1 }
  0x83   : > { %2204 = vmatpush1.bf16.msra.mxu0 %v2203_v25  ;;  %2078 = vmatprep.subr.bf16.mxu1 %v2077_v26  ;;  %v555_v42 = vld [vmem:[%s3073_s9 + $0x70] sm:$0xff]  ;;  %v2209_v43 = vpack.c.bf16 %v684_v40, %v682_v37  ;;  %v681_v44 = vld [vmem:[%s3073_s9 + $0x460] sm:$0xff]  ;;  %v558_v46 = vld [vmem:[%s3073_s9 + $0x88] sm:$0xff]  ;;  %p2764_p5 = por %p2763_p9, %p2762_p0 }
  0x84   : > { %2206 = vmatprep.subr.bf16.mxu0 %v2205_v30  ;;  %v683_v45 = vld [vmem:[%s3073_s9 + $0x470] sm:$0xff]  ;;  %v560_v47 = vld [vmem:[%s3073_s9 + $0x98] sm:$0xff]  ;;  %v686_v48 = vld [vmem:[%s3073_s9 + $0x488] sm:$0xff]  ;;  %v2083_v50 = vpack.c.bf16 %v555_v42, %v553_v41 }
  0x85   : > { %v688_v49 = vld [vmem:[%s3073_s9 + $0x498] sm:$0xff]  ;;  %v2211_v51 = vpack.c.bf16 %v683_v45, %v681_v44  ;;  %v2085_v52 = vpack.c.bf16 %v560_v47, %v558_v46  ;;  %v557_v53 = vld [vmem:[%s3073_s9 + $0x80] sm:$0xff]  ;;  %v559_v54 = vld [vmem:[%s3073_s9 + $0x90] sm:$0xff]  ;;  %p2765_p8 = pnand %p2764_p5, %p2758_p12 }
  0x86   : > { %2080 = vmatpush1.bf16.msra.mxu1 %v2079_v34  ;;  %v685_v55 = vld [vmem:[%s3073_s9 + $0x480] sm:$0xff]  ;;  %v2213_v56 = vpack.c.bf16 %v688_v49, %v686_v48  ;;  %v687_v57 = vld [vmem:[%s3073_s9 + $0x490] sm:$0xff]  ;;  %v562_v58 = vld [vmem:[%s3073_s9 + $0xa8] sm:$0xff]  ;;  %v2087_v62 = vpack.c.bf16 %v559_v54, %v557_v53 }
  0x87   : > { %2208 = vmatpush1.bf16.msra.mxu0 %v2207_v38  ;;  %2082 = vmatprep.subr.bf16.mxu1 %v2081_v39  ;;  %v564_v59 = vld [vmem:[%s3073_s9 + $0xb8] sm:$0xff]  ;;  %v690_v60 = vld [vmem:[%s3073_s9 + $0x4a8] sm:$0xff]  ;;  %v2215_v63 = vpack.c.bf16 %v687_v57, %v685_v55  ;;  %v561_v1 = vld [vmem:[%s3073_s9 + $0xa0] sm:$0xff] }
  0x88   : > { %2210 = vmatprep.subr.bf16.mxu0 %v2209_v43  ;;  %v692_v61 = vld [vmem:[%s3073_s9 + $0x4b8] sm:$0xff]  ;;  %v2089_v0 = vpack.c.bf16 %v564_v59, %v562_v58  ;;  %v563_v2 = vld [vmem:[%s3073_s9 + $0xb0] sm:$0xff]  ;;  %v689_v3 = vld [vmem:[%s3073_s9 + $0x4a0] sm:$0xff] }
  0x89   : > { %v2217_v4 = vpack.c.bf16 %v692_v61, %v690_v60  ;;  %v691_v5 = vld [vmem:[%s3073_s9 + $0x4b0] sm:$0xff]  ;;  %v566_v6 = vld [vmem:[%s3073_s9 + $0xc8] sm:$0xff]  ;;  %v568_v7 = vld [vmem:[%s3073_s9 + $0xd8] sm:$0xff]  ;;  %v2091_v10 = vpack.c.bf16 %v563_v2, %v561_v1 }
  0x8a   : > { %2084 = vmatpush1.bf16.msra.mxu1 %v2083_v50  ;;  %v694_v8 = vld [vmem:[%s3073_s9 + $0x4c8] sm:$0xff]  ;;  %v696_v9 = vld [vmem:[%s3073_s9 + $0x4d8] sm:$0xff]  ;;  %v2219_v11 = vpack.c.bf16 %v691_v5, %v689_v3  ;;  %v2093_v12 = vpack.c.bf16 %v568_v7, %v566_v6  ;;  %v565_v13 = vld [vmem:[%s3073_s9 + $0xc0] sm:$0xff] }
  0x8b   : > { %2212 = vmatpush1.bf16.msra.mxu0 %v2211_v51  ;;  %2086 = vmatprep.subr.bf16.mxu1 %v2085_v52  ;;  %v567_v14 = vld [vmem:[%s3073_s9 + $0xd0] sm:$0xff]  ;;  %v693_v15 = vld [vmem:[%s3073_s9 + $0x4c0] sm:$0xff]  ;;  %v2221_v16 = vpack.c.bf16 %v696_v9, %v694_v8  ;;  %v570_v18 = vld [vmem:[%s3073_s9 + $0xe8] sm:$0xff] }
  0x8c   : > { %2214 = vmatprep.subr.bf16.mxu0 %v2213_v56  ;;  %v695_v17 = vld [vmem:[%s3073_s9 + $0x4d0] sm:$0xff]  ;;  %v572_v19 = vld [vmem:[%s3073_s9 + $0xf8] sm:$0xff]  ;;  %v698_v20 = vld [vmem:[%s3073_s9 + $0x4e8] sm:$0xff]  ;;  %v2095_v22 = vpack.c.bf16 %v567_v14, %v565_v13 }
  0x8d   : > { %v700_v21 = vld [vmem:[%s3073_s9 + $0x4f8] sm:$0xff]  ;;  %v2223_v23 = vpack.c.bf16 %v695_v17, %v693_v15  ;;  %v2097_v24 = vpack.c.bf16 %v572_v19, %v570_v18  ;;  %v569_v25 = vld [vmem:[%s3073_s9 + $0xe0] sm:$0xff]  ;;  %v571_v26 = vld [vmem:[%s3073_s9 + $0xf0] sm:$0xff] }
  0x8e   : > { %2088 = vmatpush1.bf16.msra.mxu1 %v2087_v62  ;;  %v697_v27 = vld [vmem:[%s3073_s9 + $0x4e0] sm:$0xff]  ;;  %v2225_v28 = vpack.c.bf16 %v700_v21, %v698_v20  ;;  %v699_v29 = vld [vmem:[%s3073_s9 + $0x4f0] sm:$0xff]  ;;  %v574_v30 = vld [vmem:[%s3073_s9 + $0x108] sm:$0xff]  ;;  %v2099_v34 = vpack.c.bf16 %v571_v26, %v569_v25 }
  0x8f   : > { %2216 = vmatpush1.bf16.msra.mxu0 %v2215_v63  ;;  %2090 = vmatprep.subr.bf16.mxu1 %v2089_v0  ;;  %v576_v31 = vld [vmem:[%s3073_s9 + $0x118] sm:$0xff]  ;;  %v702_v32 = vld [vmem:[%s3073_s9 + $0x508] sm:$0xff]  ;;  %v2227_v35 = vpack.c.bf16 %v699_v29, %v697_v27  ;;  %v573_v37 = vld [vmem:[%s3073_s9 + $0x100] sm:$0xff] }
  0x90   : > { %2218 = vmatprep.subr.bf16.mxu0 %v2217_v4  ;;  %v704_v33 = vld [vmem:[%s3073_s9 + $0x518] sm:$0xff]  ;;  %v2101_v36 = vpack.c.bf16 %v576_v31, %v574_v30  ;;  %v575_v38 = vld [vmem:[%s3073_s9 + $0x110] sm:$0xff]  ;;  %v701_v39 = vld [vmem:[%s3073_s9 + $0x500] sm:$0xff] }
  0x91   : > { %v2229_v40 = vpack.c.bf16 %v704_v33, %v702_v32  ;;  %v703_v41 = vld [vmem:[%s3073_s9 + $0x510] sm:$0xff]  ;;  %v578_v42 = vld [vmem:[%s3073_s9 + $0x128] sm:$0xff]  ;;  %v580_v43 = vld [vmem:[%s3073_s9 + $0x138] sm:$0xff]  ;;  %v2103_v46 = vpack.c.bf16 %v575_v38, %v573_v37 }
  0x92   : > { %2092 = vmatpush1.bf16.msra.mxu1 %v2091_v10  ;;  %v706_v44 = vld [vmem:[%s3073_s9 + $0x528] sm:$0xff]  ;;  %v708_v45 = vld [vmem:[%s3073_s9 + $0x538] sm:$0xff]  ;;  %v2231_v47 = vpack.c.bf16 %v703_v41, %v701_v39  ;;  %v2105_v48 = vpack.c.bf16 %v580_v43, %v578_v42  ;;  %v577_v49 = vld [vmem:[%s3073_s9 + $0x120] sm:$0xff] }
  0x93   : > { %2220 = vmatpush1.bf16.msra.mxu0 %v2219_v11  ;;  %2094 = vmatprep.subr.bf16.mxu1 %v2093_v12  ;;  %v579_v50 = vld [vmem:[%s3073_s9 + $0x130] sm:$0xff]  ;;  %v705_v51 = vld [vmem:[%s3073_s9 + $0x520] sm:$0xff]  ;;  %v2233_v52 = vpack.c.bf16 %v708_v45, %v706_v44  ;;  %v582_v54 = vld [vmem:[%s3073_s9 + $0x148] sm:$0xff] }
  0x94   : > { %2222 = vmatprep.subr.bf16.mxu0 %v2221_v16  ;;  %v707_v53 = vld [vmem:[%s3073_s9 + $0x530] sm:$0xff]  ;;  %v584_v55 = vld [vmem:[%s3073_s9 + $0x158] sm:$0xff]  ;;  %v710_v56 = vld [vmem:[%s3073_s9 + $0x548] sm:$0xff]  ;;  %v2107_v58 = vpack.c.bf16 %v579_v50, %v577_v49 }
  0x95   : > { %v712_v57 = vld [vmem:[%s3073_s9 + $0x558] sm:$0xff]  ;;  %v2235_v59 = vpack.c.bf16 %v707_v53, %v705_v51  ;;  %v2109_v60 = vpack.c.bf16 %v584_v55, %v582_v54  ;;  %v581_v61 = vld [vmem:[%s3073_s9 + $0x140] sm:$0xff]  ;;  %v583_v62 = vld [vmem:[%s3073_s9 + $0x150] sm:$0xff] }
  0x96   : > { %2096 = vmatpush1.bf16.msra.mxu1 %v2095_v22  ;;  %v709_v63 = vld [vmem:[%s3073_s9 + $0x540] sm:$0xff]  ;;  %v2237_v0 = vpack.c.bf16 %v712_v57, %v710_v56  ;;  %v711_v1 = vld [vmem:[%s3073_s9 + $0x550] sm:$0xff]  ;;  %v586_v2 = vld [vmem:[%s3073_s9 + $0x168] sm:$0xff]  ;;  %v2111_v6 = vpack.c.bf16 %v583_v62, %v581_v61 }
  0x97   : > { %2224 = vmatpush1.bf16.msra.mxu0 %v2223_v23  ;;  %2098 = vmatprep.subr.bf16.mxu1 %v2097_v24  ;;  %v588_v3 = vld [vmem:[%s3073_s9 + $0x178] sm:$0xff]  ;;  %v714_v4 = vld [vmem:[%s3073_s9 + $0x568] sm:$0xff]  ;;  %v585_v7 = vld [vmem:[%s3073_s9 + $0x160] sm:$0xff]  ;;  %v2239_v8 = vpack.c.bf16 %v711_v1, %v709_v63 }
  0x98   : > { %2226 = vmatprep.subr.bf16.mxu0 %v2225_v28  ;;  %v716_v5 = vld [vmem:[%s3073_s9 + $0x578] sm:$0xff]  ;;  %v2113_v9 = vpack.c.bf16 %v588_v3, %v586_v2  ;;  %v587_v10 = vld [vmem:[%s3073_s9 + $0x170] sm:$0xff]  ;;  %v713_v11 = vld [vmem:[%s3073_s9 + $0x560] sm:$0xff] }
  0x99   : > { %v715_v12 = vld [vmem:[%s3073_s9 + $0x570] sm:$0xff]  ;;  %v2241_v13 = vpack.c.bf16 %v716_v5, %v714_v4  ;;  %v590_v14 = vld [vmem:[%s3073_s9 + $0x188] sm:$0xff]  ;;  %v592_v15 = vld [vmem:[%s3073_s9 + $0x198] sm:$0xff]  ;;  %v2115_v20 = vpack.c.bf16 %v587_v10, %v585_v7 }
  0x9a   : > { %2100 = vmatpush1.bf16.msra.mxu1 %v2099_v34  ;;  %v286_v16 = vld [vmem:[#allocation2 + $0x8] sm:$0xff]  ;;  %v720_v18 = vld [vmem:[%s3073_s9 + $0x598] sm:$0xff]  ;;  %v2243_v21 = vpack.c.bf16 %v715_v12, %v713_v11  ;;  %v2117_v22 = vpack.c.bf16 %v592_v15, %v590_v14  ;;  %v589_v23 = vld [vmem:[%s3073_s9 + $0x180] sm:$0xff] }
  0x9b   : > { %2228 = vmatpush1.bf16.msra.mxu0 %v2227_v35  ;;  %2102 = vmatprep.subr.bf16.mxu1 %v2101_v36  ;;  %v718_v17 = vld [vmem:[%s3073_s9 + $0x588] sm:$0xff]  ;;  %v591_v24 = vld [vmem:[%s3073_s9 + $0x190] sm:$0xff]  ;;  %v717_v25 = vld [vmem:[%s3073_s9 + $0x580] sm:$0xff] }
  0x9c   : > { %2230 = vmatprep.subr.bf16.mxu0 %v2229_v40  ;;  %873 = vmatprep.mubr.f32.mxu1 %v286_v16  ;;  %v290_v19 = vld [vmem:[#allocation2 + $0x28] sm:$0xff]  ;;  %v2245_v26 = vpack.c.bf16 %v720_v18, %v718_v17  ;;  %v719_v27 = vld [vmem:[%s3073_s9 + $0x590] sm:$0xff]  ;;  %v596_v29 = vld [vmem:[%s3073_s9 + $0x1b8] sm:$0xff]  ;;  %v2119_v32 = vpack.c.bf16 %v591_v24, %v589_v23 }
  0x9d   : > { %1387 = vmatprep.mubr.f32.mxu0 %v290_v19  ;;  %v594_v28 = vld [vmem:[%s3073_s9 + $0x1a8] sm:$0xff]  ;;  %v724_v31 = vld [vmem:[%s3073_s9 + $0x5b8] sm:$0xff]  ;;  %v2247_v33 = vpack.c.bf16 %v719_v27, %v717_v25  ;;  %v593_v35 = vld [vmem:[%s3073_s9 + $0x1a0] sm:$0xff] }
  0x9e   : > { %2104 = vmatpush1.bf16.msra.mxu1 %v2103_v46  ;;  %v722_v30 = vld [vmem:[%s3073_s9 + $0x5a8] sm:$0xff]  ;;  %v2121_v34 = vpack.c.bf16 %v596_v29, %v594_v28  ;;  %v595_v36 = vld [vmem:[%s3073_s9 + $0x1b0] sm:$0xff]  ;;  %v721_v37 = vld [vmem:[%s3073_s9 + $0x5a0] sm:$0xff] }
  0x9f   : > { %2232 = vmatpush1.bf16.msra.mxu0 %v2231_v47  ;;  %2106 = vmatprep.subr.bf16.mxu1 %v2105_v48  ;;  %v2249_v38 = vpack.c.bf16 %v724_v31, %v722_v30  ;;  %v723_v39 = vld [vmem:[%s3073_s9 + $0x5b0] sm:$0xff]  ;;  %v598_v40 = vld [vmem:[%s3073_s9 + $0x1c8] sm:$0xff]  ;;  %v600_v41 = vld [vmem:[%s3073_s9 + $0x1d8] sm:$0xff]  ;;  %v2123_v44 = vpack.c.bf16 %v595_v36, %v593_v35 }
  0xa0   : > { %2234 = vmatprep.subr.bf16.mxu0 %v2233_v52  ;;  %v726_v42 = vld [vmem:[%s3073_s9 + $0x5c8] sm:$0xff]  ;;  %v728_v43 = vld [vmem:[%s3073_s9 + $0x5d8] sm:$0xff]  ;;  %v2251_v45 = vpack.c.bf16 %v723_v39, %v721_v37  ;;  %v2125_v46 = vpack.c.bf16 %v600_v41, %v598_v40  ;;  %v597_v47 = vld [vmem:[%s3073_s9 + $0x1c0] sm:$0xff] }
  0xa1   : > { %v599_v48 = vld [vmem:[%s3073_s9 + $0x1d0] sm:$0xff]  ;;  %v725_v49 = vld [vmem:[%s3073_s9 + $0x5c0] sm:$0xff]  ;;  %v2253_v50 = vpack.c.bf16 %v728_v43, %v726_v42  ;;  %v602_v52 = vld [vmem:[%s3073_s9 + $0x1e8] sm:$0xff] }
  0xa2   : > { %2108 = vmatpush1.bf16.msra.mxu1 %v2107_v58  ;;  %v727_v51 = vld [vmem:[%s3073_s9 + $0x5d0] sm:$0xff]  ;;  %v604_v53 = vld [vmem:[%s3073_s9 + $0x1f8] sm:$0xff]  ;;  %v730_v54 = vld [vmem:[%s3073_s9 + $0x5e8] sm:$0xff]  ;;  %v2127_v56 = vpack.c.bf16 %v599_v48, %v597_v47 }
  0xa3   : > { %2236 = vmatpush1.bf16.msra.mxu0 %v2235_v59  ;;  %2110 = vmatprep.subr.bf16.mxu1 %v2109_v60  ;;  %v732_v55 = vld [vmem:[%s3073_s9 + $0x5f8] sm:$0xff]  ;;  %v2255_v57 = vpack.c.bf16 %v727_v51, %v725_v49  ;;  %v2129_v58 = vpack.c.bf16 %v604_v53, %v602_v52  ;;  %v601_v59 = vld [vmem:[%s3073_s9 + $0x1e0] sm:$0xff]  ;;  %v603_v60 = vld [vmem:[%s3073_s9 + $0x1f0] sm:$0xff] }
  0xa4   : > { %2238 = vmatprep.subr.bf16.mxu0 %v2237_v0  ;;  %v729_v61 = vld [vmem:[%s3073_s9 + $0x5e0] sm:$0xff]  ;;  %v2257_v62 = vpack.c.bf16 %v732_v55, %v730_v54  ;;  %v731_v63 = vld [vmem:[%s3073_s9 + $0x5f0] sm:$0xff]  ;;  %v606_v0 = vld [vmem:[%s3073_s9 + $0x208] sm:$0xff]  ;;  %v2131_v4 = vpack.c.bf16 %v603_v60, %v601_v59 }
  0xa5   : > { %v608_v1 = vld [vmem:[%s3073_s9 + $0x218] sm:$0xff]  ;;  %v734_v2 = vld [vmem:[%s3073_s9 + $0x608] sm:$0xff]  ;;  %v2259_v5 = vpack.c.bf16 %v731_v63, %v729_v61  ;;  %v605_v7 = vld [vmem:[%s3073_s9 + $0x200] sm:$0xff] }
  0xa6   : > { %2112 = vmatpush1.bf16.msra.mxu1 %v2111_v6  ;;  %v736_v3 = vld [vmem:[%s3073_s9 + $0x618] sm:$0xff]  ;;  %v2133_v6 = vpack.c.bf16 %v608_v1, %v606_v0  ;;  %v733_v10 = vld [vmem:[%s3073_s9 + $0x600] sm:$0xff]  ;;  %v735_v11 = vld [vmem:[%s3073_s9 + $0x610] sm:$0xff] }
  0xa7   : > { %2240 = vmatpush1.bf16.msra.mxu0 %v2239_v8  ;;  %2114 = vmatprep.subr.bf16.mxu1 %v2113_v9  ;;  %v607_v8 = vld [vmem:[%s3073_s9 + $0x210] sm:$0xff]  ;;  %v2261_v9 = vpack.c.bf16 %v736_v3, %v734_v2  ;;  %v610_v12 = vld [vmem:[%s3073_s9 + $0x228] sm:$0xff]  ;;  %v285_v14 = vld [vmem:[#allocation2] sm:$0xff] }
  0xa8   : > { %2242 = vmatprep.subr.bf16.mxu0 %v2241_v13  ;;  %v612_v13 = vld [vmem:[%s3073_s9 + $0x238] sm:$0xff]  ;;  %v2135_v15 = vpack.c.bf16 %v607_v8, %v605_v7  ;;  %v738_v16 = vld [vmem:[%s3073_s9 + $0x628] sm:$0xff]  ;;  %v289_v18 = vld [vmem:[#allocation2 + $0x20] sm:$0xff] }
  0xa9   : > { %v740_v17 = vld [vmem:[%s3073_s9 + $0x638] sm:$0xff]  ;;  %v294_v19 = vld [vmem:[#allocation2 + $0x48] sm:$0xff]  ;;  %v609_v23 = vld [vmem:[%s3073_s9 + $0x220] sm:$0xff] }
  0xaa   : > { %2116 = vmatpush1.bf16.msra.mxu1 %v2115_v20  ;;  %v298_v20 = vld [vmem:[#allocation2 + $0x68] sm:$0xff]  ;;  %v611_v24 = vld [vmem:[%s3073_s9 + $0x230] sm:$0xff]  ;;  %v737_v25 = vld [vmem:[%s3073_s9 + $0x620] sm:$0xff] }
  0xab   : > { %2244 = vmatpush1.bf16.msra.mxu0 %v2243_v21  ;;  %2118 = vmatprep.subr.bf16.mxu1 %v2117_v22  ;;  %v2263_v21 = vpack.c.bf16 %v735_v11, %v733_v10  ;;  %v2137_v22 = vpack.c.bf16 %v612_v13, %v610_v12  ;;  %v739_v27 = vld [vmem:[%s3073_s9 + $0x630] sm:$0xff]  ;;  %v614_v28 = vld [vmem:[%s3073_s9 + $0x248] sm:$0xff]  ;;  %v616_v29 = vld [vmem:[%s3073_s9 + $0x258] sm:$0xff]  ;;  %v2139_v36 = vpack.c.bf16 %v611_v24, %v609_v23 }
  0xac   : > { %2246 = vmatprep.subr.bf16.mxu0 %v2245_v26  ;;  %v2265_v26 = vpack.c.bf16 %v740_v17, %v738_v16  ;;  %v293_v30 = vld [vmem:[#allocation2 + $0x40] sm:$0xff]  ;;  %v742_v31 = vld [vmem:[%s3073_s9 + $0x648] sm:$0xff]  ;;  %v2267_v37 = vpack.c.bf16 %v739_v27, %v737_v25  ;;  %v615_v40 = vld [vmem:[%s3073_s9 + $0x250] sm:$0xff] }
  0xad   : > { %v306_v35 = vld [vmem:[#allocation2 + $0xa8] sm:$0xff]  ;;  %v613_v39 = vld [vmem:[%s3073_s9 + $0x240] sm:$0xff]  ;;  %v743_v43 = vld [vmem:[%s3073_s9 + $0x650] sm:$0xff] }
  0xae   : > { %2120 = vmatpush1.bf16.msra.mxu1 %v2119_v32  ;;  %v744_v32 = vld [vmem:[%s3073_s9 + $0x658] sm:$0xff]  ;;  %v741_v41 = vld [vmem:[%s3073_s9 + $0x640] sm:$0xff]  ;;  %v746_v47 = vld [vmem:[%s3073_s9 + $0x668] sm:$0xff]  ;;  %v2143_v52 = vpack.c.bf16 %v615_v40, %v613_v39 }
  0xaf   : > { %2248 = vmatpush1.bf16.msra.mxu0 %v2247_v33  ;;  %2122 = vmatprep.subr.bf16.mxu1 %v2121_v34  ;;  %v297_v33 = vld [vmem:[#allocation2 + $0x60] sm:$0xff]  ;;  %v302_v34 = vld [vmem:[#allocation2 + $0x88] sm:$0xff]  ;;  %v2269_v42 = vpack.c.bf16 %v744_v32, %v742_v31  ;;  %v748_v48 = vld [vmem:[%s3073_s9 + $0x678] sm:$0xff]  ;;  %v2271_v53 = vpack.c.bf16 %v743_v43, %v741_v41 }
  0xb0   : > { %2250 = vmatprep.subr.bf16.mxu0 %v2249_v38  ;;  %v2141_v38 = vpack.c.bf16 %v616_v29, %v614_v28  ;;  %v305_v49 = vld [vmem:[#allocation2 + $0xa0] sm:$0xff]  ;;  %v314_v51 = vld [vmem:[#allocation2 + $0xe8] sm:$0xff]  ;;  %v747_v59 = vld [vmem:[%s3073_s9 + $0x670] sm:$0xff] }
  0xb1   : > { %v617_v55 = vld [vmem:[%s3073_s9 + $0x260] sm:$0xff]  ;;  %v622_v60 = vld [vmem:[%s3073_s9 + $0x288] sm:$0xff]  ;;  %v624_v61 = vld [vmem:[%s3073_s9 + $0x298] sm:$0xff] }
  0xb2   : > { %2124 = vmatpush1.bf16.msra.mxu1 %v2123_v44  ;;  %v618_v44 = vld [vmem:[%s3073_s9 + $0x268] sm:$0xff]  ;;  %v752_v0 = vld [vmem:[%s3073_s9 + $0x698] sm:$0xff]  ;;  %v313_v1 = vld [vmem:[#allocation2 + $0xe0] sm:$0xff] }
  0xb3   : > { %2252 = vmatpush1.bf16.msra.mxu0 %v2251_v45  ;;  %2126 = vmatprep.subr.bf16.mxu1 %v2125_v46  ;;  %v620_v45 = vld [vmem:[%s3073_s9 + $0x278] sm:$0xff]  ;;  %v301_v46 = vld [vmem:[#allocation2 + $0x80] sm:$0xff]  ;;  %v750_v63 = vld [vmem:[%s3073_s9 + $0x688] sm:$0xff] }
  0xb4   : > { %2254 = vmatprep.subr.bf16.mxu0 %v2253_v50  ;;  %v310_v50 = vld [vmem:[#allocation2 + $0xc8] sm:$0xff]  ;;  %v2145_v54 = vpack.c.bf16 %v620_v45, %v618_v44  ;;  %v621_v7 = vld [vmem:[%s3073_s9 + $0x280] sm:$0xff]  ;;  %v623_v8 = vld [vmem:[%s3073_s9 + $0x290] sm:$0xff]  ;;  %v2277_v10 = vpack.c.bf16 %v752_v0, %v750_v63 }
  0xb5   : > { %v318_v2 = vld [vmem:[#allocation2 + $0x108] sm:$0xff]  ;;  %v751_v11 = vld [vmem:[%s3073_s9 + $0x690] sm:$0xff]  ;;  %v628_v13 = vld [vmem:[%s3073_s9 + $0x2b8] sm:$0xff] }
  0xb6   : > { %2128 = vmatpush1.bf16.msra.mxu1 %v2127_v56  ;;  %v619_v56 = vld [vmem:[%s3073_s9 + $0x270] sm:$0xff]  ;;  %v322_v3 = vld [vmem:[#allocation2 + $0x128] sm:$0xff]  ;;  %v756_v16 = vld [vmem:[%s3073_s9 + $0x6b8] sm:$0xff] }
  0xb7   : > { %2256 = vmatpush1.bf16.msra.mxu0 %v2255_v57  ;;  %2130 = vmatprep.subr.bf16.mxu1 %v2129_v58  ;;  %v745_v57 = vld [vmem:[%s3073_s9 + $0x660] sm:$0xff]  ;;  %v2273_v58 = vpack.c.bf16 %v748_v48, %v746_v47  ;;  %v626_v12 = vld [vmem:[%s3073_s9 + $0x2a8] sm:$0xff]  ;;  %v627_v24 = vld [vmem:[%s3073_s9 + $0x2b0] sm:$0xff] }
  0xb8   : > { %2258 = vmatprep.subr.bf16.mxu0 %v2257_v62  ;;  %v309_v62 = vld [vmem:[#allocation2 + $0xc0] sm:$0xff]  ;;  %v755_v27 = vld [vmem:[%s3073_s9 + $0x6b0] sm:$0xff]  ;;  %v630_v28 = vld [vmem:[%s3073_s9 + $0x2c8] sm:$0xff] }
  0xb9   : > { %v321_v17 = vld [vmem:[#allocation2 + $0x120] sm:$0xff]  ;;  %v632_v29 = vld [vmem:[%s3073_s9 + $0x2d8] sm:$0xff]  ;;  %v758_v31 = vld [vmem:[%s3073_s9 + $0x6c8] sm:$0xff] }
  0xba   : > { %2132 = vmatpush1.bf16.msra.mxu1 %v2131_v4  ;;  %v2147_v4 = vpack.c.bf16 %v619_v56, %v617_v55  ;;  %v625_v23 = vld [vmem:[%s3073_s9 + $0x2a0] sm:$0xff]  ;;  %v760_v32 = vld [vmem:[%s3073_s9 + $0x6d8] sm:$0xff]  ;;  %v631_v40 = vld [vmem:[%s3073_s9 + $0x2d0] sm:$0xff] }
  0xbb   : > { %2260 = vmatpush1.bf16.msra.mxu0 %v2259_v5  ;;  %2134 = vmatprep.subr.bf16.mxu1 %v2133_v6  ;;  %v2275_v5 = vpack.c.bf16 %v747_v59, %v745_v57  ;;  %v2149_v6 = vpack.c.bf16 %v624_v61, %v622_v60  ;;  %v753_v25 = vld [vmem:[%s3073_s9 + $0x6a0] sm:$0xff]  ;;  %v759_v43 = vld [vmem:[%s3073_s9 + $0x6d0] sm:$0xff]  ;;  %v634_v44 = vld [vmem:[%s3073_s9 + $0x2e8] sm:$0xff] }
  0xbc   : > { %2262 = vmatprep.subr.bf16.mxu0 %v2261_v9  ;;  %v749_v9 = vld [vmem:[%s3073_s9 + $0x680] sm:$0xff]  ;;  %v636_v45 = vld [vmem:[%s3073_s9 + $0x2f8] sm:$0xff]  ;;  %v762_v47 = vld [vmem:[%s3073_s9 + $0x6e8] sm:$0xff] }
  0xbd   : > { %874 = vmatmul.mubr.f32.vlgmr.msra.gmra.mrb[0].mxu1 %v285_v14  ;;  %v317_v14 = vld [vmem:[#allocation2 + $0x100] sm:$0xff]  ;;  %v764_v48 = vld [vmem:[%s3073_s9 + $0x6f8] sm:$0xff]  ;;  %v635_v56 = vld [vmem:[%s3073_s9 + $0x2f0] sm:$0xff] }
  0xbe   : > { %1388 = vmatmul.mubr.f32.vlgmr.msra.gmra.mrb[0].mxu0 %v289_v18  ;;  %2136 = vmatpush1.bf16.msra.mxu1 %v2135_v15  ;;  %v754_v15 = vld [vmem:[%s3073_s9 + $0x6a8] sm:$0xff]  ;;  %v629_v39 = vld [vmem:[%s3073_s9 + $0x2c0] sm:$0xff]  ;;  %v763_v59 = vld [vmem:[%s3073_s9 + $0x6f0] sm:$0xff] }
  0xbf   : > { %879 = vmatprep.mubr.f32.mxu1 %v294_v19  ;;  %1393 = vmatprep.mubr.f32.mxu0 %v298_v20  ;;  %v326_v18 = vld [vmem:[#allocation2 + $0x148] sm:$0xff]  ;;  %v2151_v20 = vpack.c.bf16 %v623_v8, %v621_v7  ;;  %v757_v41 = vld [vmem:[%s3073_s9 + $0x6c0] sm:$0xff]  ;;  %v640_v61 = vld [vmem:[%s3073_s9 + $0x318] sm:$0xff] }
  0xc0   : > { %2264 = vmatpush1.bf16.msra.mxu0 %v2263_v21  ;;  %2138 = vmatprep.subr.bf16.mxu1 %v2137_v22  ;;  %v330_v19 = vld [vmem:[#allocation2 + $0x168] sm:$0xff]  ;;  %v2279_v21 = vpack.c.bf16 %v751_v11, %v749_v9  ;;  %v2153_v22 = vpack.c.bf16 %v628_v13, %v626_v12  ;;  %v633_v55 = vld [vmem:[%s3073_s9 + $0x2e0] sm:$0xff]  ;;  %v768_v0 = vld [vmem:[%s3073_s9 + $0x718] sm:$0xff] }
  0xc1   : > { %880 = vmatmul.mubr.f32.gmra.mrb[2].mxu1 %v293_v30  ;;  %2266 = vmatprep.subr.bf16.mxu0 %v2265_v26  ;;  %v2281_v26 = vpack.c.bf16 %v756_v16, %v754_v15  ;;  %v325_v30 = vld [vmem:[#allocation2 + $0x140] sm:$0xff]  ;;  %v638_v60 = vld [vmem:[%s3073_s9 + $0x308] sm:$0xff]  ;;  %v639_v8 = vld [vmem:[%s3073_s9 + $0x310] sm:$0xff] }
  0xc2   : > { %1394 = vmatmul.mubr.f32.gmra.mrb[2].mxu0 %v297_v33  ;;  %885 = vmatprep.mubr.f32.mxu1 %v302_v34  ;;  %v329_v33 = vld [vmem:[#allocation2 + $0x160] sm:$0xff]  ;;  %v334_v34 = vld [vmem:[#allocation2 + $0x188] sm:$0xff]  ;;  %v767_v11 = vld [vmem:[%s3073_s9 + $0x710] sm:$0xff] }
  0xc3   : > { %1399 = vmatprep.mubr.f32.mxu0 %v306_v35  ;;  %2140 = vmatpush1.bf16.msra.mxu1 %v2139_v36  ;;  %v338_v35 = vld [vmem:[#allocation2 + $0x1a8] sm:$0xff]  ;;  %v2155_v36 = vpack.c.bf16 %v627_v24, %v625_v23  ;;  %v761_v57 = vld [vmem:[%s3073_s9 + $0x6e0] sm:$0xff]  ;;  %v644_v13 = vld [vmem:[%s3073_s9 + $0x338] sm:$0xff] }
  0xc4   : > { %2268 = vmatpush1.bf16.msra.mxu0 %v2267_v37  ;;  %2142 = vmatprep.subr.bf16.mxu1 %v2141_v38  ;;  %v2283_v37 = vpack.c.bf16 %v755_v27, %v753_v25  ;;  %v2157_v38 = vpack.c.bf16 %v632_v29, %v630_v28  ;;  %v766_v63 = vld [vmem:[%s3073_s9 + $0x708] sm:$0xff]  ;;  %v637_v7 = vld [vmem:[%s3073_s9 + $0x300] sm:$0xff]  ;;  %v772_v16 = vld [vmem:[%s3073_s9 + $0x738] sm:$0xff] }
  0xc5   : > { %886 = vmatmul.mubr.f32.gmra.mrb[4].mxu1 %v301_v46  ;;  %2270 = vmatprep.subr.bf16.mxu0 %v2269_v42  ;;  %v2285_v42 = vpack.c.bf16 %v760_v32, %v758_v31  ;;  %v333_v46 = vld [vmem:[#allocation2 + $0x180] sm:$0xff]  ;;  %v642_v12 = vld [vmem:[%s3073_s9 + $0x328] sm:$0xff]  ;;  %v643_v24 = vld [vmem:[%s3073_s9 + $0x330] sm:$0xff] }
  0xc6   : > { %1400 = vmatmul.mubr.f32.gmra.mrb[4].mxu0 %v305_v49  ;;  %891 = vmatprep.mubr.f32.mxu1 %v310_v50  ;;  %v337_v49 = vld [vmem:[#allocation2 + $0x1a0] sm:$0xff]  ;;  %v342_v50 = vld [vmem:[#allocation2 + $0x1c8] sm:$0xff]  ;;  %v771_v27 = vld [vmem:[%s3073_s9 + $0x730] sm:$0xff] }
  0xc7   : > { %1405 = vmatprep.mubr.f32.mxu0 %v314_v51  ;;  %2144 = vmatpush1.bf16.msra.mxu1 %v2143_v52  ;;  %v346_v51 = vld [vmem:[#allocation2 + $0x1e8] sm:$0xff]  ;;  %v2159_v52 = vpack.c.bf16 %v631_v40, %v629_v39  ;;  %v765_v9 = vld [vmem:[%s3073_s9 + $0x700] sm:$0xff]  ;;  %v648_v29 = vld [vmem:[%s3073_s9 + $0x358] sm:$0xff] }
  0xc8   : > { %2272 = vmatpush1.bf16.msra.mxu0 %v2271_v53  ;;  %2146 = vmatprep.subr.bf16.mxu1 %v2145_v54  ;;  %v2287_v53 = vpack.c.bf16 %v759_v43, %v757_v41  ;;  %v2161_v54 = vpack.c.bf16 %v636_v45, %v634_v44  ;;  %v770_v15 = vld [vmem:[%s3073_s9 + $0x728] sm:$0xff]  ;;  %v641_v23 = vld [vmem:[%s3073_s9 + $0x320] sm:$0xff]  ;;  %v776_v32 = vld [vmem:[%s3073_s9 + $0x758] sm:$0xff] }
  0xc9   : > { %892 = vmatmul.mubr.f32.gmra.mrb[6].mxu1 %v309_v62  ;;  %2274 = vmatprep.subr.bf16.mxu0 %v2273_v58  ;;  %v2289_v58 = vpack.c.bf16 %v764_v48, %v762_v47  ;;  %v341_v62 = vld [vmem:[#allocation2 + $0x1c0] sm:$0xff]  ;;  %v646_v28 = vld [vmem:[%s3073_s9 + $0x348] sm:$0xff]  ;;  %v647_v40 = vld [vmem:[%s3073_s9 + $0x350] sm:$0xff] }
  0xca   : > { %1406 = vmatmul.mubr.f32.gmra.mrb[6].mxu0 %v313_v1  ;;  %897 = vmatprep.mubr.f32.mxu1 %v318_v2  ;;  %v345_v1 = vld [vmem:[#allocation2 + $0x1e0] sm:$0xff]  ;;  %v350_v2 = vld [vmem:[#allocation2 + $0x208] sm:$0xff]  ;;  %v775_v43 = vld [vmem:[%s3073_s9 + $0x750] sm:$0xff] }
  0xcb   : > { %1411 = vmatprep.mubr.f32.mxu0 %v322_v3  ;;  %2148 = vmatpush1.bf16.msra.mxu1 %v2147_v4  ;;  %v354_v3 = vld [vmem:[#allocation2 + $0x228] sm:$0xff]  ;;  %v2163_v4 = vpack.c.bf16 %v635_v56, %v633_v55  ;;  %v769_v25 = vld [vmem:[%s3073_s9 + $0x720] sm:$0xff]  ;;  %v652_v45 = vld [vmem:[%s3073_s9 + $0x378] sm:$0xff] }
  0xcc   : > { %2276 = vmatpush1.bf16.msra.mxu0 %v2275_v5  ;;  %2150 = vmatprep.subr.bf16.mxu1 %v2149_v6  ;;  %v2291_v5 = vpack.c.bf16 %v763_v59, %v761_v57  ;;  %v2165_v6 = vpack.c.bf16 %v640_v61, %v638_v60  ;;  %v774_v31 = vld [vmem:[%s3073_s9 + $0x748] sm:$0xff]  ;;  %v645_v39 = vld [vmem:[%s3073_s9 + $0x340] sm:$0xff]  ;;  %v780_v48 = vld [vmem:[%s3073_s9 + $0x778] sm:$0xff] }
  0xcd   : > { %898 = vmatmul.mubr.f32.gmra.mrb[8].mxu1 %v317_v14  ;;  %2278 = vmatprep.subr.bf16.mxu0 %v2277_v10  ;;  %v2293_v10 = vpack.c.bf16 %v768_v0, %v766_v63  ;;  %v349_v14 = vld [vmem:[#allocation2 + $0x200] sm:$0xff]  ;;  %v650_v44 = vld [vmem:[%s3073_s9 + $0x368] sm:$0xff]  ;;  %v651_v56 = vld [vmem:[%s3073_s9 + $0x370] sm:$0xff] }
  0xce   : > { %1412 = vmatmul.mubr.f32.gmra.mrb[8].mxu0 %v321_v17  ;;  %903 = vmatprep.mubr.f32.mxu1 %v326_v18  ;;  %v353_v17 = vld [vmem:[#allocation2 + $0x220] sm:$0xff]  ;;  %v358_v18 = vld [vmem:[#allocation2 + $0x248] sm:$0xff]  ;;  %v779_v59 = vld [vmem:[%s3073_s9 + $0x770] sm:$0xff] }
  0xcf   : > { %1417 = vmatprep.mubr.f32.mxu0 %v330_v19  ;;  %2152 = vmatpush1.bf16.msra.mxu1 %v2151_v20  ;;  %v362_v19 = vld [vmem:[#allocation2 + $0x268] sm:$0xff]  ;;  %v2167_v20 = vpack.c.bf16 %v639_v8, %v637_v7  ;;  %v773_v41 = vld [vmem:[%s3073_s9 + $0x740] sm:$0xff]  ;;  %v656_v63 = vld [vmem:[%s3073_s9 + $0x398] sm:$0xff] }
  0xd0   : > { %2280 = vmatpush1.bf16.msra.mxu0 %v2279_v21  ;;  %2154 = vmatprep.subr.bf16.mxu1 %v2153_v22  ;;  %v2295_v21 = vpack.c.bf16 %v767_v11, %v765_v9  ;;  %v2169_v22 = vpack.c.bf16 %v644_v13, %v642_v12  ;;  %v778_v47 = vld [vmem:[%s3073_s9 + $0x768] sm:$0xff]  ;;  %v649_v55 = vld [vmem:[%s3073_s9 + $0x360] sm:$0xff]  ;;  %v655_v8 = vld [vmem:[%s3073_s9 + $0x390] sm:$0xff] }
  0xd1   : > { %904 = vmatmul.mubr.f32.gmra.mrb[10].mxu1 %v325_v30  ;;  %2282 = vmatprep.subr.bf16.mxu0 %v2281_v26  ;;  %v2297_v26 = vpack.c.bf16 %v772_v16, %v770_v15  ;;  %v357_v30 = vld [vmem:[#allocation2 + $0x240] sm:$0xff]  ;;  %v2305_v57 = vpack.c.bf16 %v780_v48, %v778_v47  ;;  %v654_v60 = vld [vmem:[%s3073_s9 + $0x388] sm:$0xff]  ;;  %v783_v11 = vld [vmem:[%s3073_s9 + $0x790] sm:$0xff] }
  0xd2   : > { %1418 = vmatmul.mubr.f32.gmra.mrb[10].mxu0 %v329_v33  ;;  %909 = vmatprep.mubr.f32.mxu1 %v334_v34  ;;  %v361_v33 = vld [vmem:[#allocation2 + $0x260] sm:$0xff]  ;;  %v366_v34 = vld [vmem:[#allocation2 + $0x288] sm:$0xff]  ;;  %v791_v47 = vld [vmem:[%s3073_s9 + $0x7d0] sm:$0xff] }
  0xd3   : > { %1423 = vmatprep.mubr.f32.mxu0 %v338_v35  ;;  %2156 = vmatpush1.bf16.msra.mxu1 %v2155_v36  ;;  %v370_v35 = vld [vmem:[#allocation2 + $0x2a8] sm:$0xff]  ;;  %v2171_v36 = vpack.c.bf16 %v643_v24, %v641_v23  ;;  %v373_v61 = vld [vmem:[#allocation2 + $0x2c0] sm:$0xff]  ;;  %v788_v24 = vld [vmem:[%s3073_s9 + $0x7b8] sm:$0xff] }
  0xd4   : > { %2284 = vmatpush1.bf16.msra.mxu0 %v2283_v37  ;;  %2158 = vmatprep.subr.bf16.mxu1 %v2157_v38  ;;  %v2299_v37 = vpack.c.bf16 %v771_v27, %v769_v25  ;;  %v2173_v38 = vpack.c.bf16 %v648_v29, %v646_v28  ;;  %v382_v0 = vld [vmem:[#allocation2 + $0x308] sm:$0xff]  ;;  %v653_v7 = vld [vmem:[%s3073_s9 + $0x380] sm:$0xff]  ;;  %v787_v28 = vld [vmem:[%s3073_s9 + $0x7b0] sm:$0xff] }
  0xd5   : > { %910 = vmatmul.mubr.f32.gmra.mrb[12].mxu1 %v333_v46  ;;  %2286 = vmatprep.subr.bf16.mxu0 %v2285_v42  ;;  %v2301_v42 = vpack.c.bf16 %v776_v32, %v774_v31  ;;  %v365_v46 = vld [vmem:[#allocation2 + $0x280] sm:$0xff]  ;;  %v394_v15 = vld [vmem:[#allocation2 + $0x368] sm:$0xff]  ;;  %v2183_v16 = vpack.c.bf16 %v655_v8, %v653_v7 }
  0xd6   : > { %1424 = vmatmul.mubr.f32.gmra.mrb[12].mxu0 %v337_v49  ;;  %915 = vmatprep.mubr.f32.mxu1 %v342_v50  ;;  %v369_v49 = vld [vmem:[#allocation2 + $0x2a0] sm:$0xff]  ;;  %v374_v50 = vld [vmem:[#allocation2 + $0x2c8] sm:$0xff] }
  0xd7   : > { %1429 = vmatprep.mubr.f32.mxu0 %v346_v51  ;;  %2160 = vmatpush1.bf16.msra.mxu1 %v2159_v52  ;;  %v2175_v51 = vpack.c.bf16 %v647_v40, %v645_v39  ;;  %v378_v52 = vld [vmem:[#allocation2 + $0x2e8] sm:$0xff]  ;;  %v381_v12 = vld [vmem:[#allocation2 + $0x300] sm:$0xff]  ;;  %v663_v39 = vld [vmem:[%s3073_s9 + $0x3d0] sm:$0xff] }
  0xd8   : > { %2288 = vmatpush1.bf16.msra.mxu0 %v2287_v53  ;;  %2162 = vmatprep.subr.bf16.mxu1 %v2161_v54  ;;  %v2303_v53 = vpack.c.bf16 %v775_v43, %v773_v41  ;;  %v2177_v54 = vpack.c.bf16 %v652_v45, %v650_v44  ;;  %v385_v13 = vld [vmem:[#allocation2 + $0x320] sm:$0xff]  ;;  %v786_v23 = vld [vmem:[%s3073_s9 + $0x7a8] sm:$0xff] }
  0xd9   : > { %916 = vmatmul.mubr.f32.gmra.mrb[14].mxu1 %v341_v62  ;;  %2290 = vmatprep.subr.bf16.mxu0 %v2289_v58  ;;  %v777_v58 = vld [vmem:[%s3073_s9 + $0x760] sm:$0xff]  ;;  %v402_v32 = vld [vmem:[#allocation2 + $0x3a8] sm:$0xff] }
  0xda   : > { %1430 = vmatmul.mubr.f32.gmra.mrb[14].mxu0 %v345_v1  ;;  %921 = vmatprep.mubr.f32.mxu1 %v350_v2  ;;  %v377_v62 = vld [vmem:[#allocation2 + $0x2e0] sm:$0xff]  ;;  %v2179_v1 = vpack.c.bf16 %v651_v56, %v649_v55  ;;  %v782_v2 = vld [vmem:[%s3073_s9 + $0x788] sm:$0xff] }
  0xdb   : > { %1435 = vmatprep.mubr.f32.mxu0 %v354_v3  ;;  %2164 = vmatpush1.bf16.msra.mxu1 %v2163_v4  ;;  %v784_v3 = vld [vmem:[%s3073_s9 + $0x798] sm:$0xff]  ;;  %v386_v4 = vld [vmem:[#allocation2 + $0x328] sm:$0xff]  ;;  %v389_v25 = vld [vmem:[#allocation2 + $0x340] sm:$0xff] }
  0xdc   : > { %2292 = vmatpush1.bf16.msra.mxu0 %v2291_v5  ;;  %2166 = vmatprep.subr.bf16.mxu1 %v2165_v6  ;;  %v2307_v5 = vpack.c.bf16 %v779_v59, %v777_v58  ;;  %v2181_v6 = vpack.c.bf16 %v656_v63, %v654_v60  ;;  %v2309_v9 = vpack.c.bf16 %v784_v3, %v782_v2  ;;  %v785_v27 = vld [vmem:[%s3073_s9 + $0x7a0] sm:$0xff]  ;;  %v790_v41 = vld [vmem:[%s3073_s9 + $0x7c8] sm:$0xff]  ;;  %v796_v59 = vld [vmem:[%s3073_s9 + $0x7f8] sm:$0xff] }
  0xdd   : > { %922 = vmatmul.mubr.f32.gmra.mrb[16].mxu1 %v349_v14  ;;  %2294 = vmatprep.subr.bf16.mxu0 %v2293_v10  ;;  %v781_v10 = vld [vmem:[%s3073_s9 + $0x780] sm:$0xff]  ;;  %v390_v14 = vld [vmem:[#allocation2 + $0x348] sm:$0xff] }
  0xde   : > { %1436 = vmatmul.mubr.f32.gmra.mrb[16].mxu0 %v353_v17  ;;  %927 = vmatprep.mubr.f32.mxu1 %v358_v18  ;;  %v658_v17 = vld [vmem:[%s3073_s9 + $0x3a8] sm:$0xff]  ;;  %v660_v18 = vld [vmem:[%s3073_s9 + $0x3b8] sm:$0xff]  ;;  %v393_v29 = vld [vmem:[#allocation2 + $0x360] sm:$0xff] }
  0xdf   : > { %1441 = vmatprep.mubr.f32.mxu0 %v362_v19  ;;  %2168 = vmatpush1.bf16.msra.mxu1 %v2167_v20  ;;  %v2311_v19 = vpack.c.bf16 %v783_v11, %v781_v10  ;;  %v2185_v20 = vpack.c.bf16 %v660_v18, %v658_v17  ;;  %v401_v40 = vld [vmem:[#allocation2 + $0x3a0] sm:$0xff]  ;;  %v406_v43 = vld [vmem:[#allocation2 + $0x3c8] sm:$0xff] }
  0xe0   : > { %2296 = vmatpush1.bf16.msra.mxu0 %v2295_v21  ;;  %2170 = vmatprep.subr.bf16.mxu1 %v2169_v22  ;;  %v657_v21 = vld [vmem:[%s3073_s9 + $0x3a0] sm:$0xff]  ;;  %v659_v22 = vld [vmem:[%s3073_s9 + $0x3b0] sm:$0xff]  ;;  %v410_v48 = vld [vmem:[#allocation2 + $0x3e8] sm:$0xff] }
  0xe1   : > { %928 = vmatmul.mubr.f32.gmra.mrb[18].mxu1 %v357_v30  ;;  %2298 = vmatprep.subr.bf16.mxu0 %v2297_v26  ;;  %v2313_v26 = vpack.c.bf16 %v788_v24, %v786_v23  ;;  %v398_v30 = vld [vmem:[#allocation2 + $0x388] sm:$0xff]  ;;  %v2187_v31 = vpack.c.bf16 %v659_v22, %v657_v21  ;;  %v665_v55 = vld [vmem:[%s3073_s9 + $0x3e0] sm:$0xff] }
  0xe2   : > { %1442 = vmatmul.mubr.f32.gmra.mrb[18].mxu0 %v361_v33  ;;  %933 = vmatprep.mubr.f32.mxu1 %v366_v34  ;;  %v2315_v33 = vpack.c.bf16 %v787_v28, %v785_v27  ;;  %v662_v34 = vld [vmem:[%s3073_s9 + $0x3c8] sm:$0xff]  ;;  %v793_v63 = vld [vmem:[%s3073_s9 + $0x7e0] sm:$0xff] }
  0xe3   : > { %1447 = vmatprep.mubr.f32.mxu0 %v370_v35  ;;  %2172 = vmatpush1.bf16.msra.mxu1 %v2171_v36  ;;  %v664_v35 = vld [vmem:[%s3073_s9 + $0x3d8] sm:$0xff]  ;;  %v397_v36 = vld [vmem:[#allocation2 + $0x380] sm:$0xff]  ;;  %v794_v58 = vld [vmem:[%s3073_s9 + $0x7e8] sm:$0xff] }
  0xe4   : > { %2300 = vmatpush1.bf16.msra.mxu0 %v2299_v37  ;;  %2174 = vmatprep.subr.bf16.mxu1 %v2173_v38  ;;  %v2189_v37 = vpack.c.bf16 %v664_v35, %v662_v34  ;;  %v661_v38 = vld [vmem:[%s3073_s9 + $0x3c0] sm:$0xff]  ;;  %v418_v60 = vld [vmem:[#allocation2 + $0x428] sm:$0xff] }
  0xe5   : > { %934 = vmatmul.mubr.f32.gmra.mrb[20].mxu1 %v365_v46  ;;  %2302 = vmatprep.subr.bf16.mxu0 %v2301_v42  ;;  %v792_v42 = vld [vmem:[%s3073_s9 + $0x7d8] sm:$0xff]  ;;  %v2191_v44 = vpack.c.bf16 %v663_v39, %v661_v38  ;;  %v789_v46 = vld [vmem:[%s3073_s9 + $0x7c0] sm:$0xff]  ;;  %v430_v8 = vld [vmem:[#allocation2 + $0x488] sm:$0xff] }
  0xe6   : > { %1448 = vmatmul.mubr.f32.gmra.mrb[20].mxu0 %v369_v49  ;;  %939 = vmatprep.mubr.f32.mxu1 %v374_v50  ;;  %v2317_v45 = vpack.c.bf16 %v792_v42, %v790_v41  ;;  %v2319_v49 = vpack.c.bf16 %v791_v47, %v789_v46  ;;  %v405_v50 = vld [vmem:[#allocation2 + $0x3c0] sm:$0xff]  ;;  %v450_v17 = vld [vmem:[#allocation2 + $0x528] sm:$0xff] }
  0xe7   : > { %1453 = vmatprep.mubr.f32.mxu0 %v378_v52  ;;  %2176 = vmatpush1.bf16.msra.mxu1 %v2175_v51  ;;  %v409_v51 = vld [vmem:[#allocation2 + $0x3e0] sm:$0xff]  ;;  %v666_v52 = vld [vmem:[%s3073_s9 + $0x3e8] sm:$0xff] }
  0xe8   : > { %2304 = vmatpush1.bf16.msra.mxu0 %v2303_v53  ;;  %2178 = vmatprep.subr.bf16.mxu1 %v2177_v54  ;;  %v414_v53 = vld [vmem:[#allocation2 + $0x408] sm:$0xff]  ;;  %v668_v54 = vld [vmem:[%s3073_s9 + $0x3f8] sm:$0xff]  ;;  %v417_v3 = vld [vmem:[#allocation2 + $0x420] sm:$0xff] }
  0xe9   : > { %940 = vmatmul.mubr.f32.gmra.mrb[22].mxu1 %v373_v61  ;;  %2306 = vmatprep.subr.bf16.mxu0 %v2305_v57  ;;  %v2193_v56 = vpack.c.bf16 %v668_v54, %v666_v52  ;;  %v667_v57 = vld [vmem:[%s3073_s9 + $0x3f0] sm:$0xff]  ;;  %v425_v7 = vld [vmem:[#allocation2 + $0x460] sm:$0xff]  ;;  %v458_v21 = vld [vmem:[#allocation2 + $0x568] sm:$0xff] }
  0xea   : > { %1454 = vmatmul.mubr.f32.gmra.mrb[22].mxu0 %v377_v62  ;;  %945 = vmatprep.mubr.f32.mxu1 %v382_v0  ;;  %v2195_v61 = vpack.c.bf16 %v667_v57, %v665_v55  ;;  %v2321_v62 = vpack.c.bf16 %v796_v59, %v794_v58  ;;  %v795_v0 = vld [vmem:[%s3073_s9 + $0x7f0] sm:$0xff]  ;;  %v429_v10 = vld [vmem:[#allocation2 + $0x480] sm:$0xff]  ;;  %v462_v24 = vld [vmem:[#allocation2 + $0x588] sm:$0xff] }
  0xeb   : > { %1459 = vmatprep.mubr.f32.mxu0 %v386_v4  ;;  %2180 = vmatpush1.bf16.msra.mxu1 %v2179_v1  ;;  %v413_v1 = vld [vmem:[#allocation2 + $0x400] sm:$0xff]  ;;  %v2323_v2 = vpack.c.bf16 %v795_v0, %v793_v63  ;;  %v422_v4 = vld [vmem:[#allocation2 + $0x448] sm:$0xff]  ;;  %v288_v0 = vld [vmem:[#allocation2 + $0x18] sm:$0xff] }
  0xec   : > { %2308 = vmatpush1.bf16.msra.mxu0 %v2307_v5  ;;  %2182 = vmatprep.subr.bf16.mxu1 %v2181_v6  ;;  %v426_v5 = vld [vmem:[#allocation2 + $0x468] sm:$0xff]  ;;  %v421_v6 = vld [vmem:[#allocation2 + $0x440] sm:$0xff] }
  0xed   : > { %946 = vmatmul.mubr.f32.gmra.mrb[24].mxu1 %v381_v12  ;;  %2310 = vmatprep.subr.bf16.mxu0 %v2309_v9  ;;  %v434_v9 = vld [vmem:[#allocation2 + $0x4a8] sm:$0xff]  ;;  %v433_v11 = vld [vmem:[#allocation2 + $0x4a0] sm:$0xff] }
  0xee   : > { %1460 = vmatmul.mubr.f32.gmra.mrb[24].mxu0 %v385_v13  ;;  %951 = vmatprep.mubr.f32.mxu1 %v390_v14  ;;  %v438_v12 = vld [vmem:[#allocation2 + $0x4c8] sm:$0xff]  ;;  %v437_v14 = vld [vmem:[#allocation2 + $0x4c0] sm:$0xff] }
  0xef   : > { %1465 = vmatprep.mubr.f32.mxu0 %v394_v15  ;;  %2184 = vmatpush1.bf16.msra.mxu1 %v2183_v16  ;;  %v442_v13 = vld [vmem:[#allocation2 + $0x4e8] sm:$0xff]  ;;  %v441_v15 = vld [vmem:[#allocation2 + $0x4e0] sm:$0xff] }
  0xf0   : > { %2312 = vmatpush1.bf16.msra.mxu0 %v2311_v19  ;;  %2186 = vmatprep.subr.bf16.mxu1 %v2185_v20  ;;  %v446_v16 = vld [vmem:[#allocation2 + $0x508] sm:$0xff]  ;;  %v445_v18 = vld [vmem:[#allocation2 + $0x500] sm:$0xff] }
  0xf1   : > { %952 = vmatmul.mubr.f32.gmra.mrb[26].mxu1 %v389_v25  ;;  %2314 = vmatprep.subr.bf16.mxu0 %v2313_v26  ;;  %v449_v19 = vld [vmem:[#allocation2 + $0x520] sm:$0xff]  ;;  %v454_v20 = vld [vmem:[#allocation2 + $0x548] sm:$0xff] }
  0xf2   : > { %1466 = vmatmul.mubr.f32.gmra.mrb[26].mxu0 %v393_v29  ;;  %957 = vmatprep.mubr.f32.mxu1 %v398_v30  ;;  %v453_v22 = vld [vmem:[#allocation2 + $0x540] sm:$0xff]  ;;  %v466_v25 = vld [vmem:[#allocation2 + $0x5a8] sm:$0xff] }
  0xf3   : > { %1471 = vmatprep.mubr.f32.mxu0 %v402_v32  ;;  %2188 = vmatpush1.bf16.msra.mxu1 %v2187_v31  ;;  %v457_v23 = vld [vmem:[#allocation2 + $0x560] sm:$0xff]  ;;  %v470_v28 = vld [vmem:[#allocation2 + $0x5c8] sm:$0xff] }
  0xf4   : > { %2316 = vmatpush1.bf16.msra.mxu0 %v2315_v33  ;;  %2190 = vmatprep.subr.bf16.mxu1 %v2189_v37  ;;  %v461_v26 = vld [vmem:[#allocation2 + $0x580] sm:$0xff]  ;;  %v474_v29 = vld [vmem:[#allocation2 + $0x5e8] sm:$0xff] }
  0xf5   : > { %958 = vmatmul.mubr.f32.gmra.mrb[28].mxu1 %v397_v36  ;;  %2318 = vmatprep.subr.bf16.mxu0 %v2317_v45  ;;  %v465_v27 = vld [vmem:[#allocation2 + $0x5a0] sm:$0xff]  ;;  %v478_v32 = vld [vmem:[#allocation2 + $0x608] sm:$0xff] }
  0xf6   : > { %1472 = vmatmul.mubr.f32.gmra.mrb[28].mxu0 %v401_v40  ;;  %963 = vmatprep.mubr.f32.mxu1 %v406_v43  ;;  %v469_v30 = vld [vmem:[#allocation2 + $0x5c0] sm:$0xff]  ;;  %v482_v33 = vld [vmem:[#allocation2 + $0x628] sm:$0xff] }
  0xf7   : > { %1477 = vmatprep.mubr.f32.mxu0 %v410_v48  ;;  %2192 = vmatpush1.bf16.msra.mxu1 %v2191_v44  ;;  %v473_v31 = vld [vmem:[#allocation2 + $0x5e0] sm:$0xff]  ;;  %v486_v36 = vld [vmem:[#allocation2 + $0x648] sm:$0xff] }
  0xf8   : > { %2320 = vmatpush1.bf16.msra.mxu0 %v2319_v49  ;;  %2194 = vmatprep.subr.bf16.mxu1 %v2193_v56  ;;  %v477_v34 = vld [vmem:[#allocation2 + $0x600] sm:$0xff]  ;;  %v490_v37 = vld [vmem:[#allocation2 + $0x668] sm:$0xff] }
  0xf9   : > { %964 = vmatmul.mubr.f32.gmra.mrb[30].mxu1 %v405_v50  ;;  %2322 = vmatprep.subr.bf16.mxu0 %v2321_v62  ;;  %v481_v35 = vld [vmem:[#allocation2 + $0x620] sm:$0xff]  ;;  %v494_v40 = vld [vmem:[#allocation2 + $0x688] sm:$0xff] }
  0xfa   : > { %1478 = vmatmul.mubr.f32.gmra.mrb[30].mxu0 %v409_v51  ;;  %969 = vmatprep.mubr.f32.mxu1 %v414_v53  ;;  %v485_v38 = vld [vmem:[#allocation2 + $0x640] sm:$0xff]  ;;  %v498_v41 = vld [vmem:[#allocation2 + $0x6a8] sm:$0xff] }
  0xfb   : > { %1483 = vmatprep.mubr.f32.mxu0 %v418_v60  ;;  %2196 = vmatpush1.bf16.msra.mxu1 %v2195_v61  ;;  %v489_v39 = vld [vmem:[#allocation2 + $0x660] sm:$0xff]  ;;  %v502_v44 = vld [vmem:[#allocation2 + $0x6c8] sm:$0xff] }
  0xfc   : > { %2324 = vmatpush1.bf16.msra.mxu0 %v2323_v2  ;;  %v493_v42 = vld [vmem:[#allocation2 + $0x680] sm:$0xff]  ;;  %v506_v45 = vld [vmem:[#allocation2 + $0x6e8] sm:$0xff]  ;;  %v287_v2 = vld [vmem:[#allocation2 + $0x10] sm:$0xff] }
  0xfd   : > { %970 = vmatmul.mubr.f32.gmra.mrb[32].mxu1 %v413_v1  ;;  %v497_v43 = vld [vmem:[#allocation2 + $0x6a0] sm:$0xff]  ;;  %v510_v48 = vld [vmem:[#allocation2 + $0x708] sm:$0xff]  ;;  %v292_v1 = vld [vmem:[#allocation2 + $0x38] sm:$0xff] }
  0xfe   : > { %1484 = vmatmul.mubr.f32.gmra.mrb[32].mxu0 %v417_v3  ;;  %975 = vmatprep.mubr.f32.mxu1 %v422_v4  ;;  %v501_v46 = vld [vmem:[#allocation2 + $0x6c0] sm:$0xff]  ;;  %v514_v49 = vld [vmem:[#allocation2 + $0x728] sm:$0xff]  ;;  %v291_v3 = vld [vmem:[#allocation2 + $0x30] sm:$0xff] }
  0xff   : > { %1489 = vmatprep.mubr.f32.mxu0 %v426_v5  ;;  %v505_v47 = vld [vmem:[#allocation2 + $0x6e0] sm:$0xff]  ;;  %v518_v52 = vld [vmem:[#allocation2 + $0x748] sm:$0xff]  ;;  %v296_v4 = vld [vmem:[#allocation2 + $0x58] sm:$0xff] }
 0x100   : > { %v509_v50 = vld [vmem:[#allocation2 + $0x700] sm:$0xff]  ;;  %v522_v53 = vld [vmem:[#allocation2 + $0x768] sm:$0xff]  ;;  %v300_v5 = vld [vmem:[#allocation2 + $0x78] sm:$0xff] }
 0x101   : > { %976 = vmatmul.mubr.f32.gmra.mrb[34].mxu1 %v421_v6  ;;  %v513_v51 = vld [vmem:[#allocation2 + $0x720] sm:$0xff]  ;;  %v526_v56 = vld [vmem:[#allocation2 + $0x788] sm:$0xff]  ;;  %v295_v6 = vld [vmem:[#allocation2 + $0x50] sm:$0xff] }
 0x102   : > { %1490 = vmatmul.mubr.f32.gmra.mrb[34].mxu0 %v425_v7  ;;  %981 = vmatprep.mubr.f32.mxu1 %v430_v8  ;;  %v517_v54 = vld [vmem:[#allocation2 + $0x740] sm:$0xff]  ;;  %v530_v57 = vld [vmem:[#allocation2 + $0x7a8] sm:$0xff]  ;;  %v299_v7 = vld [vmem:[#allocation2 + $0x70] sm:$0xff] }
 0x103   : > { %1495 = vmatprep.mubr.f32.mxu0 %v434_v9  ;;  %v521_v55 = vld [vmem:[#allocation2 + $0x760] sm:$0xff]  ;;  %v534_v60 = vld [vmem:[#allocation2 + $0x7c8] sm:$0xff]  ;;  %v304_v8 = vld [vmem:[#allocation2 + $0x98] sm:$0xff] }
 0x104   : > { %v525_v58 = vld [vmem:[#allocation2 + $0x780] sm:$0xff]  ;;  %v538_v61 = vld [vmem:[#allocation2 + $0x7e8] sm:$0xff]  ;;  %v308_v9 = vld [vmem:[#allocation2 + $0xb8] sm:$0xff] }
 0x105   : > { %982 = vmatmul.mubr.f32.gmra.mrb[36].mxu1 %v429_v10  ;;  %v529_v59 = vld [vmem:[#allocation2 + $0x7a0] sm:$0xff]  ;;  %v303_v10 = vld [vmem:[#allocation2 + $0x90] sm:$0xff] }
 0x106   : > { %1496 = vmatmul.mubr.f32.gmra.mrb[36].mxu0 %v433_v11  ;;  %987 = vmatprep.mubr.f32.mxu1 %v438_v12  ;;  %v533_v62 = vld [vmem:[#allocation2 + $0x7c0] sm:$0xff]  ;;  %v307_v11 = vld [vmem:[#allocation2 + $0xb0] sm:$0xff]  ;;  %v312_v12 = vld [vmem:[#allocation2 + $0xd8] sm:$0xff] }
 0x107   : > { %1501 = vmatprep.mubr.f32.mxu0 %v442_v13  ;;  %v537_v63 = vld [vmem:[#allocation2 + $0x7e0] sm:$0xff]  ;;  %v316_v13 = vld [vmem:[#allocation2 + $0xf8] sm:$0xff] }
 0x109   : > { %988 = vmatmul.mubr.f32.gmra.mrb[38].mxu1 %v437_v14  ;;  %v311_v14 = vld [vmem:[#allocation2 + $0xd0] sm:$0xff] }
 0x10a   : > { %1502 = vmatmul.mubr.f32.gmra.mrb[38].mxu0 %v441_v15  ;;  %993 = vmatprep.mubr.f32.mxu1 %v446_v16  ;;  %v315_v15 = vld [vmem:[#allocation2 + $0xf0] sm:$0xff]  ;;  %v320_v16 = vld [vmem:[#allocation2 + $0x118] sm:$0xff] }
 0x10b   : > { %1507 = vmatprep.mubr.f32.mxu0 %v450_v17  ;;  %v324_v17 = vld [vmem:[#allocation2 + $0x138] sm:$0xff] }
 0x10d   : > { %994 = vmatmul.mubr.f32.gmra.mrb[40].mxu1 %v445_v18  ;;  %v319_v18 = vld [vmem:[#allocation2 + $0x110] sm:$0xff] }
 0x10e   : > { %1508 = vmatmul.mubr.f32.gmra.mrb[40].mxu0 %v449_v19  ;;  %999 = vmatprep.mubr.f32.mxu1 %v454_v20  ;;  %v323_v19 = vld [vmem:[#allocation2 + $0x130] sm:$0xff]  ;;  %v328_v20 = vld [vmem:[#allocation2 + $0x158] sm:$0xff] }
 0x10f   : > { %1513 = vmatprep.mubr.f32.mxu0 %v458_v21  ;;  %v332_v21 = vld [vmem:[#allocation2 + $0x178] sm:$0xff] }
 0x111   : > { %1000 = vmatmul.mubr.f32.gmra.mrb[42].mxu1 %v453_v22  ;;  %v327_v22 = vld [vmem:[#allocation2 + $0x150] sm:$0xff] }
 0x112   : > { %1514 = vmatmul.mubr.f32.gmra.mrb[42].mxu0 %v457_v23  ;;  %1005 = vmatprep.mubr.f32.mxu1 %v462_v24  ;;  %v331_v23 = vld [vmem:[#allocation2 + $0x170] sm:$0xff]  ;;  %v336_v24 = vld [vmem:[#allocation2 + $0x198] sm:$0xff] }
 0x113   : > { %1519 = vmatprep.mubr.f32.mxu0 %v466_v25  ;;  %v340_v25 = vld [vmem:[#allocation2 + $0x1b8] sm:$0xff] }
 0x115   : > { %1006 = vmatmul.mubr.f32.gmra.mrb[44].mxu1 %v461_v26  ;;  %v335_v26 = vld [vmem:[#allocation2 + $0x190] sm:$0xff] }
 0x116   : > { %1520 = vmatmul.mubr.f32.gmra.mrb[44].mxu0 %v465_v27  ;;  %1011 = vmatprep.mubr.f32.mxu1 %v470_v28  ;;  %v339_v27 = vld [vmem:[#allocation2 + $0x1b0] sm:$0xff]  ;;  %v344_v28 = vld [vmem:[#allocation2 + $0x1d8] sm:$0xff] }
 0x117   : > { %1525 = vmatprep.mubr.f32.mxu0 %v474_v29  ;;  %v348_v29 = vld [vmem:[#allocation2 + $0x1f8] sm:$0xff] }
 0x119   : > { %1012 = vmatmul.mubr.f32.gmra.mrb[46].mxu1 %v469_v30  ;;  %v343_v30 = vld [vmem:[#allocation2 + $0x1d0] sm:$0xff] }
 0x11a   : > { %1526 = vmatmul.mubr.f32.gmra.mrb[46].mxu0 %v473_v31  ;;  %1017 = vmatprep.mubr.f32.mxu1 %v478_v32  ;;  %v347_v31 = vld [vmem:[#allocation2 + $0x1f0] sm:$0xff]  ;;  %v352_v32 = vld [vmem:[#allocation2 + $0x218] sm:$0xff] }
 0x11b   : > { %1531 = vmatprep.mubr.f32.mxu0 %v482_v33  ;;  %v356_v33 = vld [vmem:[#allocation2 + $0x238] sm:$0xff] }
 0x11d   : > { %1018 = vmatmul.mubr.f32.gmra.mrb[48].mxu1 %v477_v34  ;;  %v351_v34 = vld [vmem:[#allocation2 + $0x210] sm:$0xff] }
 0x11e   : > { %1532 = vmatmul.mubr.f32.gmra.mrb[48].mxu0 %v481_v35  ;;  %1023 = vmatprep.mubr.f32.mxu1 %v486_v36  ;;  %v355_v35 = vld [vmem:[#allocation2 + $0x230] sm:$0xff]  ;;  %v360_v36 = vld [vmem:[#allocation2 + $0x258] sm:$0xff] }
 0x11f   : > { %1537 = vmatprep.mubr.f32.mxu0 %v490_v37  ;;  %v364_v37 = vld [vmem:[#allocation2 + $0x278] sm:$0xff] }
 0x121   : > { %1024 = vmatmul.mubr.f32.gmra.mrb[50].mxu1 %v485_v38  ;;  %v359_v38 = vld [vmem:[#allocation2 + $0x250] sm:$0xff] }
 0x122   : > { %1538 = vmatmul.mubr.f32.gmra.mrb[50].mxu0 %v489_v39  ;;  %1029 = vmatprep.mubr.f32.mxu1 %v494_v40  ;;  %v363_v39 = vld [vmem:[#allocation2 + $0x270] sm:$0xff]  ;;  %v368_v40 = vld [vmem:[#allocation2 + $0x298] sm:$0xff] }
 0x123   : > { %1543 = vmatprep.mubr.f32.mxu0 %v498_v41  ;;  %v372_v41 = vld [vmem:[#allocation2 + $0x2b8] sm:$0xff] }
 0x125   : > { %1030 = vmatmul.mubr.f32.gmra.mrb[52].mxu1 %v493_v42  ;;  %v367_v42 = vld [vmem:[#allocation2 + $0x290] sm:$0xff] }
 0x126   : > { %1544 = vmatmul.mubr.f32.gmra.mrb[52].mxu0 %v497_v43  ;;  %1035 = vmatprep.mubr.f32.mxu1 %v502_v44  ;;  %v371_v43 = vld [vmem:[#allocation2 + $0x2b0] sm:$0xff]  ;;  %v376_v44 = vld [vmem:[#allocation2 + $0x2d8] sm:$0xff] }
 0x127   : > { %1549 = vmatprep.mubr.f32.mxu0 %v506_v45  ;;  %v380_v45 = vld [vmem:[#allocation2 + $0x2f8] sm:$0xff] }
 0x129   : > { %1036 = vmatmul.mubr.f32.gmra.mrb[54].mxu1 %v501_v46  ;;  %v375_v46 = vld [vmem:[#allocation2 + $0x2d0] sm:$0xff] }
 0x12a   : > { %1550 = vmatmul.mubr.f32.gmra.mrb[54].mxu0 %v505_v47  ;;  %1041 = vmatprep.mubr.f32.mxu1 %v510_v48  ;;  %v379_v47 = vld [vmem:[#allocation2 + $0x2f0] sm:$0xff]  ;;  %v384_v48 = vld [vmem:[#allocation2 + $0x318] sm:$0xff] }
 0x12b   : > { %1555 = vmatprep.mubr.f32.mxu0 %v514_v49  ;;  %v388_v49 = vld [vmem:[#allocation2 + $0x338] sm:$0xff] }
 0x12d   : > { %1042 = vmatmul.mubr.f32.gmra.mrb[56].mxu1 %v509_v50  ;;  %v383_v50 = vld [vmem:[#allocation2 + $0x310] sm:$0xff] }
 0x12e   : > { %1556 = vmatmul.mubr.f32.gmra.mrb[56].mxu0 %v513_v51  ;;  %1047 = vmatprep.mubr.f32.mxu1 %v518_v52  ;;  %v387_v51 = vld [vmem:[#allocation2 + $0x330] sm:$0xff]  ;;  %v392_v52 = vld [vmem:[#allocation2 + $0x358] sm:$0xff] }
 0x12f   : > { %1561 = vmatprep.mubr.f32.mxu0 %v522_v53  ;;  %v396_v53 = vld [vmem:[#allocation2 + $0x378] sm:$0xff] }
 0x131   : > { %1048 = vmatmul.mubr.f32.gmra.mrb[58].mxu1 %v517_v54  ;;  %v391_v54 = vld [vmem:[#allocation2 + $0x350] sm:$0xff] }
 0x132   : > { %1562 = vmatmul.mubr.f32.gmra.mrb[58].mxu0 %v521_v55  ;;  %1053 = vmatprep.mubr.f32.mxu1 %v526_v56  ;;  %v395_v55 = vld [vmem:[#allocation2 + $0x370] sm:$0xff]  ;;  %v400_v56 = vld [vmem:[#allocation2 + $0x398] sm:$0xff] }
 0x133   : > { %1567 = vmatprep.mubr.f32.mxu0 %v530_v57  ;;  %v404_v57 = vld [vmem:[#allocation2 + $0x3b8] sm:$0xff] }
 0x135   : > { %1054 = vmatmul.mubr.f32.gmra.mrb[60].mxu1 %v525_v58  ;;  %v399_v58 = vld [vmem:[#allocation2 + $0x390] sm:$0xff] }
 0x136   : > { %1568 = vmatmul.mubr.f32.gmra.mrb[60].mxu0 %v529_v59  ;;  %1059 = vmatprep.mubr.f32.mxu1 %v534_v60  ;;  %v403_v59 = vld [vmem:[#allocation2 + $0x3b0] sm:$0xff]  ;;  %v408_v60 = vld [vmem:[#allocation2 + $0x3d8] sm:$0xff] }
 0x137   : > { %1573 = vmatprep.mubr.f32.mxu0 %v538_v61  ;;  %v412_v61 = vld [vmem:[#allocation2 + $0x3f8] sm:$0xff] }
 0x139   : > { %1060 = vmatmul.mubr.f32.gmra.mrb[62].mxu1 %v533_v62  ;;  %v407_v62 = vld [vmem:[#allocation2 + $0x3d0] sm:$0xff] }
 0x13a   : > { %1574 = vmatmul.mubr.f32.gmra.mrb[62].mxu0 %v537_v63  ;;  %1130 = vmatprep.mubr.f32.mxu1 %v288_v0  ;;  %v411_v63 = vld [vmem:[#allocation2 + $0x3f0] sm:$0xff]  ;;  %v416_v0 = vld [vmem:[#allocation2 + $0x418] sm:$0xff] }
 0x13b   : > { %1644 = vmatprep.mubr.f32.mxu0 %v292_v1  ;;  %v420_v1 = vld [vmem:[#allocation2 + $0x438] sm:$0xff] }
 0x13d   : > { %1131 = vmatmul.mubr.f32.vlgmr.msra.gmra.mrb[0].mxu1 %v287_v2  ;;  %v415_v2 = vld [vmem:[#allocation2 + $0x410] sm:$0xff] }
 0x13e   : > { %1645 = vmatmul.mubr.f32.vlgmr.msra.gmra.mrb[0].mxu0 %v291_v3  ;;  %1136 = vmatprep.mubr.f32.mxu1 %v296_v4  ;;  %v419_v3 = vld [vmem:[#allocation2 + $0x430] sm:$0xff]  ;;  %v424_v4 = vld [vmem:[#allocation2 + $0x458] sm:$0xff] }
 0x13f   : > { %1650 = vmatprep.mubr.f32.mxu0 %v300_v5  ;;  %v428_v5 = vld [vmem:[#allocation2 + $0x478] sm:$0xff] }
 0x141   : > { %1137 = vmatmul.mubr.f32.gmra.mrb[2].mxu1 %v295_v6  ;;  %v423_v6 = vld [vmem:[#allocation2 + $0x450] sm:$0xff] }
 0x142   : > { %1651 = vmatmul.mubr.f32.gmra.mrb[2].mxu0 %v299_v7  ;;  %1142 = vmatprep.mubr.f32.mxu1 %v304_v8  ;;  %v427_v7 = vld [vmem:[#allocation2 + $0x470] sm:$0xff]  ;;  %v432_v8 = vld [vmem:[#allocation2 + $0x498] sm:$0xff] }
 0x143   : > { %1656 = vmatprep.mubr.f32.mxu0 %v308_v9  ;;  %v436_v9 = vld [vmem:[#allocation2 + $0x4b8] sm:$0xff] }
 0x145   : > { %1143 = vmatmul.mubr.f32.gmra.mrb[4].mxu1 %v303_v10  ;;  %v431_v10 = vld [vmem:[#allocation2 + $0x490] sm:$0xff] }
 0x146   : > { %1657 = vmatmul.mubr.f32.gmra.mrb[4].mxu0 %v307_v11  ;;  %1148 = vmatprep.mubr.f32.mxu1 %v312_v12  ;;  %v435_v11 = vld [vmem:[#allocation2 + $0x4b0] sm:$0xff]  ;;  %v440_v12 = vld [vmem:[#allocation2 + $0x4d8] sm:$0xff] }
 0x147   : > { %1662 = vmatprep.mubr.f32.mxu0 %v316_v13  ;;  %v444_v13 = vld [vmem:[#allocation2 + $0x4f8] sm:$0xff] }
 0x149   : > { %1149 = vmatmul.mubr.f32.gmra.mrb[6].mxu1 %v311_v14  ;;  %v439_v14 = vld [vmem:[#allocation2 + $0x4d0] sm:$0xff] }
 0x14a   : > { %1663 = vmatmul.mubr.f32.gmra.mrb[6].mxu0 %v315_v15  ;;  %1154 = vmatprep.mubr.f32.mxu1 %v320_v16  ;;  %v443_v15 = vld [vmem:[#allocation2 + $0x4f0] sm:$0xff]  ;;  %v448_v16 = vld [vmem:[#allocation2 + $0x518] sm:$0xff] }
 0x14b   : > { %1668 = vmatprep.mubr.f32.mxu0 %v324_v17  ;;  %v452_v17 = vld [vmem:[#allocation2 + $0x538] sm:$0xff] }
 0x14d   : > { %1155 = vmatmul.mubr.f32.gmra.mrb[8].mxu1 %v319_v18  ;;  %v447_v18 = vld [vmem:[#allocation2 + $0x510] sm:$0xff] }
 0x14e   : > { %1669 = vmatmul.mubr.f32.gmra.mrb[8].mxu0 %v323_v19  ;;  %1160 = vmatprep.mubr.f32.mxu1 %v328_v20  ;;  %v451_v19 = vld [vmem:[#allocation2 + $0x530] sm:$0xff]  ;;  %v456_v20 = vld [vmem:[#allocation2 + $0x558] sm:$0xff] }
 0x14f   : > { %1674 = vmatprep.mubr.f32.mxu0 %v332_v21  ;;  %v460_v21 = vld [vmem:[#allocation2 + $0x578] sm:$0xff] }
 0x151   : > { %1161 = vmatmul.mubr.f32.gmra.mrb[10].mxu1 %v327_v22  ;;  %v455_v22 = vld [vmem:[#allocation2 + $0x550] sm:$0xff] }
 0x152   : > { %1675 = vmatmul.mubr.f32.gmra.mrb[10].mxu0 %v331_v23  ;;  %1166 = vmatprep.mubr.f32.mxu1 %v336_v24  ;;  %v459_v23 = vld [vmem:[#allocation2 + $0x570] sm:$0xff]  ;;  %v464_v24 = vld [vmem:[#allocation2 + $0x598] sm:$0xff] }
 0x153   : > { %1680 = vmatprep.mubr.f32.mxu0 %v340_v25  ;;  %v468_v25 = vld [vmem:[#allocation2 + $0x5b8] sm:$0xff] }
 0x155   : > { %1167 = vmatmul.mubr.f32.gmra.mrb[12].mxu1 %v335_v26  ;;  %v463_v26 = vld [vmem:[#allocation2 + $0x590] sm:$0xff] }
 0x156   : > { %1681 = vmatmul.mubr.f32.gmra.mrb[12].mxu0 %v339_v27  ;;  %1172 = vmatprep.mubr.f32.mxu1 %v344_v28  ;;  %v467_v27 = vld [vmem:[#allocation2 + $0x5b0] sm:$0xff]  ;;  %v472_v28 = vld [vmem:[#allocation2 + $0x5d8] sm:$0xff] }
 0x157   : > { %1686 = vmatprep.mubr.f32.mxu0 %v348_v29  ;;  %v476_v29 = vld [vmem:[#allocation2 + $0x5f8] sm:$0xff] }
 0x159   : > { %1173 = vmatmul.mubr.f32.gmra.mrb[14].mxu1 %v343_v30  ;;  %v471_v30 = vld [vmem:[#allocation2 + $0x5d0] sm:$0xff] }
 0x15a   : > { %1687 = vmatmul.mubr.f32.gmra.mrb[14].mxu0 %v347_v31  ;;  %1178 = vmatprep.mubr.f32.mxu1 %v352_v32  ;;  %v475_v31 = vld [vmem:[#allocation2 + $0x5f0] sm:$0xff]  ;;  %v480_v32 = vld [vmem:[#allocation2 + $0x618] sm:$0xff] }
 0x15b   : > { %1692 = vmatprep.mubr.f32.mxu0 %v356_v33  ;;  %v484_v33 = vld [vmem:[#allocation2 + $0x638] sm:$0xff] }
 0x15d   : > { %1179 = vmatmul.mubr.f32.gmra.mrb[16].mxu1 %v351_v34  ;;  %v479_v34 = vld [vmem:[#allocation2 + $0x610] sm:$0xff] }
 0x15e   : > { %1693 = vmatmul.mubr.f32.gmra.mrb[16].mxu0 %v355_v35  ;;  %1184 = vmatprep.mubr.f32.mxu1 %v360_v36  ;;  %v483_v35 = vld [vmem:[#allocation2 + $0x630] sm:$0xff]  ;;  %v488_v36 = vld [vmem:[#allocation2 + $0x658] sm:$0xff] }
 0x15f   : > { %1698 = vmatprep.mubr.f32.mxu0 %v364_v37  ;;  %v492_v37 = vld [vmem:[#allocation2 + $0x678] sm:$0xff] }
 0x161   : > { %1185 = vmatmul.mubr.f32.gmra.mrb[18].mxu1 %v359_v38  ;;  %v487_v38 = vld [vmem:[#allocation2 + $0x650] sm:$0xff] }
 0x162   : > { %1699 = vmatmul.mubr.f32.gmra.mrb[18].mxu0 %v363_v39  ;;  %1190 = vmatprep.mubr.f32.mxu1 %v368_v40  ;;  %v491_v39 = vld [vmem:[#allocation2 + $0x670] sm:$0xff]  ;;  %v496_v40 = vld [vmem:[#allocation2 + $0x698] sm:$0xff] }
 0x163   : > { %1704 = vmatprep.mubr.f32.mxu0 %v372_v41  ;;  %v500_v41 = vld [vmem:[#allocation2 + $0x6b8] sm:$0xff] }
 0x165   : > { %1191 = vmatmul.mubr.f32.gmra.mrb[20].mxu1 %v367_v42  ;;  %v495_v42 = vld [vmem:[#allocation2 + $0x690] sm:$0xff] }
 0x166   : > { %1705 = vmatmul.mubr.f32.gmra.mrb[20].mxu0 %v371_v43  ;;  %1196 = vmatprep.mubr.f32.mxu1 %v376_v44  ;;  %v499_v43 = vld [vmem:[#allocation2 + $0x6b0] sm:$0xff]  ;;  %v504_v44 = vld [vmem:[#allocation2 + $0x6d8] sm:$0xff] }
 0x167   : > { %1710 = vmatprep.mubr.f32.mxu0 %v380_v45  ;;  %v508_v45 = vld [vmem:[#allocation2 + $0x6f8] sm:$0xff] }
 0x169   : > { %1197 = vmatmul.mubr.f32.gmra.mrb[22].mxu1 %v375_v46  ;;  %v503_v46 = vld [vmem:[#allocation2 + $0x6d0] sm:$0xff] }
 0x16a   : > { %1711 = vmatmul.mubr.f32.gmra.mrb[22].mxu0 %v379_v47  ;;  %1202 = vmatprep.mubr.f32.mxu1 %v384_v48  ;;  %v507_v47 = vld [vmem:[#allocation2 + $0x6f0] sm:$0xff]  ;;  %v512_v48 = vld [vmem:[#allocation2 + $0x718] sm:$0xff] }
 0x16b   : > { %1716 = vmatprep.mubr.f32.mxu0 %v388_v49  ;;  %v516_v49 = vld [vmem:[#allocation2 + $0x738] sm:$0xff] }
 0x16d   : > { %1203 = vmatmul.mubr.f32.gmra.mrb[24].mxu1 %v383_v50  ;;  %v511_v50 = vld [vmem:[#allocation2 + $0x710] sm:$0xff] }
 0x16e   : > { %1717 = vmatmul.mubr.f32.gmra.mrb[24].mxu0 %v387_v51  ;;  %1208 = vmatprep.mubr.f32.mxu1 %v392_v52  ;;  %v515_v51 = vld [vmem:[#allocation2 + $0x730] sm:$0xff]  ;;  %v520_v52 = vld [vmem:[#allocation2 + $0x758] sm:$0xff] }
 0x16f   : > { %1722 = vmatprep.mubr.f32.mxu0 %v396_v53  ;;  %v524_v53 = vld [vmem:[#allocation2 + $0x778] sm:$0xff] }
 0x171   : > { %1209 = vmatmul.mubr.f32.gmra.mrb[26].mxu1 %v391_v54  ;;  %v519_v54 = vld [vmem:[#allocation2 + $0x750] sm:$0xff] }
 0x172   : > { %1723 = vmatmul.mubr.f32.gmra.mrb[26].mxu0 %v395_v55  ;;  %1214 = vmatprep.mubr.f32.mxu1 %v400_v56  ;;  %v523_v55 = vld [vmem:[#allocation2 + $0x770] sm:$0xff]  ;;  %v528_v56 = vld [vmem:[#allocation2 + $0x798] sm:$0xff] }
 0x173   : > { %1728 = vmatprep.mubr.f32.mxu0 %v404_v57  ;;  %v532_v57 = vld [vmem:[#allocation2 + $0x7b8] sm:$0xff] }
 0x175   : > { %1215 = vmatmul.mubr.f32.gmra.mrb[28].mxu1 %v399_v58  ;;  %v527_v58 = vld [vmem:[#allocation2 + $0x790] sm:$0xff] }
 0x176   : > { %1729 = vmatmul.mubr.f32.gmra.mrb[28].mxu0 %v403_v59  ;;  %1220 = vmatprep.mubr.f32.mxu1 %v408_v60  ;;  %v531_v59 = vld [vmem:[#allocation2 + $0x7b0] sm:$0xff]  ;;  %v536_v60 = vld [vmem:[#allocation2 + $0x7d8] sm:$0xff] }
 0x177   : > { %1734 = vmatprep.mubr.f32.mxu0 %v412_v61  ;;  %v540_v61 = vld [vmem:[#allocation2 + $0x7f8] sm:$0xff] }
 0x179   : > { %1221 = vmatmul.mubr.f32.gmra.mrb[30].mxu1 %v407_v62  ;;  %v535_v62 = vld [vmem:[#allocation2 + $0x7d0] sm:$0xff] }
 0x17a   : > { %1735 = vmatmul.mubr.f32.gmra.mrb[30].mxu0 %v411_v63  ;;  %1226 = vmatprep.mubr.f32.mxu1 %v416_v0  ;;  %v539_v63 = vld [vmem:[#allocation2 + $0x7f0] sm:$0xff]  ;;  %v799_v0 = vlaneseq }
 0x17b   : > { %1740 = vmatprep.mubr.f32.mxu0 %v420_v1 }
 0x17c   : > { %v800_v1 = vshrl.u32 %v799_v0, 7 }
 0x17d   : > { %1227 = vmatmul.mubr.f32.gmra.mrb[32].mxu1 %v415_v2 }
 0x17e   : > { %1741 = vmatmul.mubr.f32.gmra.mrb[32].mxu0 %v419_v3  ;;  %1232 = vmatprep.mubr.f32.mxu1 %v424_v4  ;;  %v801_v2 = vsub.s32 0, %v800_v1  ;;  %v797_v3 = vld [vmem:[%s250_s30] sm:$0x3]  ;;  %v805_v4 = vsub.s32 1, %v800_v1 }
 0x17f   : > { %1746 = vmatprep.mubr.f32.mxu0 %v428_v5 }
 0x180   : > { %v3336_v5 = vrot.slane %v797_v3, %v801_v2 }
 0x181   : > { %1233 = vmatmul.mubr.f32.gmra.mrb[34].mxu1 %v423_v6  ;;  %v3338_v6 = vrot.slane %v797_v3, %v805_v4 }
 0x182   : > { %1747 = vmatmul.mubr.f32.gmra.mrb[34].mxu0 %v427_v7  ;;  %1238 = vmatprep.mubr.f32.mxu1 %v432_v8 }
 0x183   : > { %1752 = vmatprep.mubr.f32.mxu0 %v436_v9 }
 0x185   : > { %1239 = vmatmul.mubr.f32.gmra.mrb[36].mxu1 %v431_v10 }
 0x186   : > { %1753 = vmatmul.mubr.f32.gmra.mrb[36].mxu0 %v435_v11  ;;  %1244 = vmatprep.mubr.f32.mxu1 %v440_v12 }
 0x187   : > { %1758 = vmatprep.mubr.f32.mxu0 %v444_v13 }
 0x189   : > { %1245 = vmatmul.mubr.f32.gmra.mrb[38].mxu1 %v439_v14 }
 0x18a   : > { %1759 = vmatmul.mubr.f32.gmra.mrb[38].mxu0 %v443_v15  ;;  %1250 = vmatprep.mubr.f32.mxu1 %v448_v16 }
 0x18b   : > { %1764 = vmatprep.mubr.f32.mxu0 %v452_v17 }
 0x18d   : > { %1251 = vmatmul.mubr.f32.gmra.mrb[40].mxu1 %v447_v18 }
 0x18e   : > { %1765 = vmatmul.mubr.f32.gmra.mrb[40].mxu0 %v451_v19  ;;  %1256 = vmatprep.mubr.f32.mxu1 %v456_v20 }
 0x18f   : > { %1770 = vmatprep.mubr.f32.mxu0 %v460_v21 }
 0x191   : > { %1257 = vmatmul.mubr.f32.gmra.mrb[42].mxu1 %v455_v22 }
 0x192   : > { %1771 = vmatmul.mubr.f32.gmra.mrb[42].mxu0 %v459_v23  ;;  %1262 = vmatprep.mubr.f32.mxu1 %v464_v24 }
 0x193   : > { %1776 = vmatprep.mubr.f32.mxu0 %v468_v25 }
 0x195   : > { %1263 = vmatmul.mubr.f32.gmra.mrb[44].mxu1 %v463_v26 }
 0x196   : > { %1777 = vmatmul.mubr.f32.gmra.mrb[44].mxu0 %v467_v27  ;;  %1268 = vmatprep.mubr.f32.mxu1 %v472_v28 }
 0x197   : > { %1782 = vmatprep.mubr.f32.mxu0 %v476_v29 }
 0x199   : > { %1269 = vmatmul.mubr.f32.gmra.mrb[46].mxu1 %v471_v30 }
 0x19a   : > { %1783 = vmatmul.mubr.f32.gmra.mrb[46].mxu0 %v475_v31  ;;  %1274 = vmatprep.mubr.f32.mxu1 %v480_v32 }
 0x19b   : > { %1788 = vmatprep.mubr.f32.mxu0 %v484_v33 }
 0x19d   : > { %1275 = vmatmul.mubr.f32.gmra.mrb[48].mxu1 %v479_v34 }
 0x19e   : > { %1789 = vmatmul.mubr.f32.gmra.mrb[48].mxu0 %v483_v35  ;;  %1280 = vmatprep.mubr.f32.mxu1 %v488_v36 }
 0x19f   : > { %1794 = vmatprep.mubr.f32.mxu0 %v492_v37 }
 0x1a1   : > { %1281 = vmatmul.mubr.f32.gmra.mrb[50].mxu1 %v487_v38 }
 0x1a2   : > { %1795 = vmatmul.mubr.f32.gmra.mrb[50].mxu0 %v491_v39  ;;  %1286 = vmatprep.mubr.f32.mxu1 %v496_v40 }
 0x1a3   : > { %1800 = vmatprep.mubr.f32.mxu0 %v500_v41 }
 0x1a5   : > { %1287 = vmatmul.mubr.f32.gmra.mrb[52].mxu1 %v495_v42 }
 0x1a6   : > { %1801 = vmatmul.mubr.f32.gmra.mrb[52].mxu0 %v499_v43  ;;  %1292 = vmatprep.mubr.f32.mxu1 %v504_v44 }
 0x1a7   : > { %1806 = vmatprep.mubr.f32.mxu0 %v508_v45 }
 0x1a9   : > { %1293 = vmatmul.mubr.f32.gmra.mrb[54].mxu1 %v503_v46 }
 0x1aa   : > { %1807 = vmatmul.mubr.f32.gmra.mrb[54].mxu0 %v507_v47  ;;  %1298 = vmatprep.mubr.f32.mxu1 %v512_v48 }
 0x1ab   : > { %1812 = vmatprep.mubr.f32.mxu0 %v516_v49 }
 0x1ad   : > { %1299 = vmatmul.mubr.f32.gmra.mrb[56].mxu1 %v511_v50 }
 0x1ae   : > { %1813 = vmatmul.mubr.f32.gmra.mrb[56].mxu0 %v515_v51  ;;  %1304 = vmatprep.mubr.f32.mxu1 %v520_v52 }
 0x1af   : > { %1818 = vmatprep.mubr.f32.mxu0 %v524_v53 }
 0x1b1   : > { %1305 = vmatmul.mubr.f32.gmra.mrb[58].mxu1 %v519_v54 }
 0x1b2   : > { %1819 = vmatmul.mubr.f32.gmra.mrb[58].mxu0 %v523_v55  ;;  %1310 = vmatprep.mubr.f32.mxu1 %v528_v56 }
 0x1b3   : > { %1824 = vmatprep.mubr.f32.mxu0 %v532_v57 }
 0x1b5   : > { %1311 = vmatmul.mubr.f32.gmra.mrb[60].mxu1 %v527_v58 }
 0x1b6   : > { %1825 = vmatmul.mubr.f32.gmra.mrb[60].mxu0 %v531_v59  ;;  %1316 = vmatprep.mubr.f32.mxu1 %v536_v60 }
 0x1b7   : > { %1830 = vmatprep.mubr.f32.mxu0 %v540_v61 }
 0x1b9   : > { %1317 = vmatmul.mubr.f32.gmra.mrb[62].mxu1 %v535_v62 }
 0x1ba   : > { %1831 = vmatmul.mubr.f32.gmra.mrb[62].mxu0 %v539_v63 }
 0x210   : > { %v1132_v7 = vpop.f32.mrb[0].mxu1 }
 0x211   : > { %v2325_v8 = vadd.f32 %v1132_v7, %v3336_v5  ;;  %v1646_v9 = vpop.f32.mrb[0].mxu0  ;;  %v1134_v10 = vpop.f32.mrb[1].mxu1 }
 0x212   : > { %v2327_v11 = vadd.f32 %v1134_v10, %v3338_v6  ;;  %v1648_v12 = vpop.f32.mrb[1].mxu0 }
 0x213   : > { %v2326_v13 = vadd.f32 %v2325_v8, %v1646_v9 }
 0x214   : > { %v2328_v14 = vadd.f32 %v2327_v11, %v1648_v12  ;;  %v1138_v15 = vpop.f32.mrb[2].mxu1 }
 0x215   : > { %1837 = vst [vmem:[%s3343_s8] sm:$0xff] %v2326_v13  ;;  %v2329_v16 = vadd.f32 %v1138_v15, %v3336_v5  ;;  %v1652_v17 = vpop.f32.mrb[2].mxu0  ;;  %v1140_v18 = vpop.f32.mrb[3].mxu1 }
 0x216   : > { %1838 = vst [vmem:[%s3343_s8 + $0x8] sm:$0xff] %v2328_v14  ;;  %v2331_v19 = vadd.f32 %v1140_v18, %v3338_v6  ;;  %v1654_v20 = vpop.f32.mrb[3].mxu0 }
 0x217   : > { %v2330_v21 = vadd.f32 %v2329_v16, %v1652_v17 }
 0x218   : > { %v2332_v22 = vadd.f32 %v2331_v19, %v1654_v20  ;;  %v1144_v23 = vpop.f32.mrb[4].mxu1 }
 0x219   : > { %1839 = vst [vmem:[%s3343_s8 + $0x10] sm:$0xff] %v2330_v21  ;;  %v2333_v24 = vadd.f32 %v1144_v23, %v3336_v5  ;;  %v1658_v25 = vpop.f32.mrb[4].mxu0  ;;  %v1146_v26 = vpop.f32.mrb[5].mxu1 }
 0x21a   : > { %1840 = vst [vmem:[%s3343_s8 + $0x18] sm:$0xff] %v2332_v22  ;;  %v2335_v27 = vadd.f32 %v1146_v26, %v3338_v6  ;;  %v1660_v28 = vpop.f32.mrb[5].mxu0 }
 0x21b   : > { %v2334_v29 = vadd.f32 %v2333_v24, %v1658_v25 }
 0x21c   : > { %v2336_v30 = vadd.f32 %v2335_v27, %v1660_v28  ;;  %v1150_v31 = vpop.f32.mrb[6].mxu1 }
 0x21d   : > { %1841 = vst [vmem:[%s3343_s8 + $0x20] sm:$0xff] %v2334_v29  ;;  %v2337_v32 = vadd.f32 %v1150_v31, %v3336_v5  ;;  %v1664_v33 = vpop.f32.mrb[6].mxu0  ;;  %v1152_v34 = vpop.f32.mrb[7].mxu1 }
 0x21e   : > { %1842 = vst [vmem:[%s3343_s8 + $0x28] sm:$0xff] %v2336_v30  ;;  %v2339_v35 = vadd.f32 %v1152_v34, %v3338_v6  ;;  %v1666_v36 = vpop.f32.mrb[7].mxu0 }
 0x21f   : > { %v2338_v37 = vadd.f32 %v2337_v32, %v1664_v33 }
 0x220   : > { %v2340_v38 = vadd.f32 %v2339_v35, %v1666_v36  ;;  %v1156_v39 = vpop.f32.mrb[8].mxu1 }
 0x221   : > { %1843 = vst [vmem:[%s3343_s8 + $0x30] sm:$0xff] %v2338_v37  ;;  %v2341_v40 = vadd.f32 %v1156_v39, %v3336_v5  ;;  %v1670_v41 = vpop.f32.mrb[8].mxu0  ;;  %v1158_v42 = vpop.f32.mrb[9].mxu1 }
 0x222   : > { %1844 = vst [vmem:[%s3343_s8 + $0x38] sm:$0xff] %v2340_v38  ;;  %v2343_v43 = vadd.f32 %v1158_v42, %v3338_v6  ;;  %v1672_v44 = vpop.f32.mrb[9].mxu0 }
 0x223   : > { %v2342_v45 = vadd.f32 %v2341_v40, %v1670_v41 }
 0x224   : > { %v2344_v46 = vadd.f32 %v2343_v43, %v1672_v44  ;;  %v1162_v47 = vpop.f32.mrb[10].mxu1 }
 0x225   : > { %1845 = vst [vmem:[%s3343_s8 + $0x40] sm:$0xff] %v2342_v45  ;;  %v2345_v48 = vadd.f32 %v1162_v47, %v3336_v5  ;;  %v1676_v49 = vpop.f32.mrb[10].mxu0  ;;  %v1164_v50 = vpop.f32.mrb[11].mxu1 }
 0x226   : > { %1846 = vst [vmem:[%s3343_s8 + $0x48] sm:$0xff] %v2344_v46  ;;  %v2347_v51 = vadd.f32 %v1164_v50, %v3338_v6  ;;  %v1678_v52 = vpop.f32.mrb[11].mxu0 }
 0x227   : > { %v2346_v53 = vadd.f32 %v2345_v48, %v1676_v49 }
 0x228   : > { %v2348_v54 = vadd.f32 %v2347_v51, %v1678_v52  ;;  %v1168_v55 = vpop.f32.mrb[12].mxu1 }
 0x229   : > { %1847 = vst [vmem:[%s3343_s8 + $0x50] sm:$0xff] %v2346_v53  ;;  %v2349_v56 = vadd.f32 %v1168_v55, %v3336_v5  ;;  %v1682_v57 = vpop.f32.mrb[12].mxu0  ;;  %v1170_v58 = vpop.f32.mrb[13].mxu1 }
 0x22a   : > { %1848 = vst [vmem:[%s3343_s8 + $0x58] sm:$0xff] %v2348_v54  ;;  %v2351_v59 = vadd.f32 %v1170_v58, %v3338_v6  ;;  %v1684_v60 = vpop.f32.mrb[13].mxu0 }
 0x22b   : > { %v2350_v61 = vadd.f32 %v2349_v56, %v1682_v57 }
 0x22c   : > { %v2352_v62 = vadd.f32 %v2351_v59, %v1684_v60  ;;  %v1174_v63 = vpop.f32.mrb[14].mxu1 }
 0x22d   : > { %1849 = vst [vmem:[%s3343_s8 + $0x60] sm:$0xff] %v2350_v61  ;;  %v2353_v0 = vadd.f32 %v1174_v63, %v3336_v5  ;;  %v1688_v1 = vpop.f32.mrb[14].mxu0  ;;  %v1176_v2 = vpop.f32.mrb[15].mxu1 }
 0x22e   : > { %1850 = vst [vmem:[%s3343_s8 + $0x68] sm:$0xff] %v2352_v62  ;;  %v2355_v3 = vadd.f32 %v1176_v2, %v3338_v6  ;;  %v1690_v4 = vpop.f32.mrb[15].mxu0 }
 0x22f   : > { %v2354_v7 = vadd.f32 %v2353_v0, %v1688_v1 }
 0x230   : > { %v2356_v8 = vadd.f32 %v2355_v3, %v1690_v4  ;;  %v1180_v9 = vpop.f32.mrb[16].mxu1 }
 0x231   : > { %1851 = vst [vmem:[%s3343_s8 + $0x70] sm:$0xff] %v2354_v7  ;;  %v2357_v10 = vadd.f32 %v1180_v9, %v3336_v5  ;;  %v1694_v11 = vpop.f32.mrb[16].mxu0  ;;  %v1182_v12 = vpop.f32.mrb[17].mxu1 }
 0x232   : > { %1852 = vst [vmem:[%s3343_s8 + $0x78] sm:$0xff] %v2356_v8  ;;  %v2359_v13 = vadd.f32 %v1182_v12, %v3338_v6  ;;  %v1696_v14 = vpop.f32.mrb[17].mxu0 }
 0x233   : > { %v2358_v15 = vadd.f32 %v2357_v10, %v1694_v11 }
 0x234   : > { %v2360_v16 = vadd.f32 %v2359_v13, %v1696_v14  ;;  %v1186_v17 = vpop.f32.mrb[18].mxu1 }
 0x235   : > { %1853 = vst [vmem:[%s3343_s8 + $0x80] sm:$0xff] %v2358_v15  ;;  %v2361_v18 = vadd.f32 %v1186_v17, %v3336_v5  ;;  %v1700_v19 = vpop.f32.mrb[18].mxu0  ;;  %v1188_v20 = vpop.f32.mrb[19].mxu1 }
 0x236   : > { %1854 = vst [vmem:[%s3343_s8 + $0x88] sm:$0xff] %v2360_v16  ;;  %v2363_v21 = vadd.f32 %v1188_v20, %v3338_v6  ;;  %v1702_v22 = vpop.f32.mrb[19].mxu0 }
 0x237   : > { %v2362_v23 = vadd.f32 %v2361_v18, %v1700_v19 }
 0x238   : > { %v2364_v24 = vadd.f32 %v2363_v21, %v1702_v22  ;;  %v1192_v25 = vpop.f32.mrb[20].mxu1 }
 0x239   : > { %1855 = vst [vmem:[%s3343_s8 + $0x90] sm:$0xff] %v2362_v23  ;;  %v2365_v26 = vadd.f32 %v1192_v25, %v3336_v5  ;;  %v1706_v27 = vpop.f32.mrb[20].mxu0  ;;  %v1194_v28 = vpop.f32.mrb[21].mxu1 }
 0x23a   : > { %1856 = vst [vmem:[%s3343_s8 + $0x98] sm:$0xff] %v2364_v24  ;;  %v2367_v29 = vadd.f32 %v1194_v28, %v3338_v6  ;;  %v1708_v30 = vpop.f32.mrb[21].mxu0 }
 0x23b   : > { %v2366_v31 = vadd.f32 %v2365_v26, %v1706_v27 }
 0x23c   : > { %v2368_v32 = vadd.f32 %v2367_v29, %v1708_v30  ;;  %v1198_v33 = vpop.f32.mrb[22].mxu1 }
 0x23d   : > { %1857 = vst [vmem:[%s3343_s8 + $0xa0] sm:$0xff] %v2366_v31  ;;  %v2369_v34 = vadd.f32 %v1198_v33, %v3336_v5  ;;  %v1712_v35 = vpop.f32.mrb[22].mxu0  ;;  %v1200_v36 = vpop.f32.mrb[23].mxu1 }
 0x23e   : > { %1858 = vst [vmem:[%s3343_s8 + $0xa8] sm:$0xff] %v2368_v32  ;;  %v2371_v37 = vadd.f32 %v1200_v36, %v3338_v6  ;;  %v1714_v38 = vpop.f32.mrb[23].mxu0 }
 0x23f   : > { %v2370_v39 = vadd.f32 %v2369_v34, %v1712_v35 }
 0x240   : > { %v2372_v40 = vadd.f32 %v2371_v37, %v1714_v38  ;;  %v1204_v41 = vpop.f32.mrb[24].mxu1 }
 0x241   : > { %1859 = vst [vmem:[%s3343_s8 + $0xb0] sm:$0xff] %v2370_v39  ;;  %v2373_v42 = vadd.f32 %v1204_v41, %v3336_v5  ;;  %v1718_v43 = vpop.f32.mrb[24].mxu0  ;;  %v1206_v44 = vpop.f32.mrb[25].mxu1 }
 0x242   : > { %1860 = vst [vmem:[%s3343_s8 + $0xb8] sm:$0xff] %v2372_v40  ;;  %v2375_v45 = vadd.f32 %v1206_v44, %v3338_v6  ;;  %v1720_v46 = vpop.f32.mrb[25].mxu0 }
 0x243   : > { %v2374_v47 = vadd.f32 %v2373_v42, %v1718_v43 }
 0x244   : > { %v2376_v48 = vadd.f32 %v2375_v45, %v1720_v46  ;;  %v1210_v49 = vpop.f32.mrb[26].mxu1 }
 0x245   : > { %1861 = vst [vmem:[%s3343_s8 + $0xc0] sm:$0xff] %v2374_v47  ;;  %v2377_v50 = vadd.f32 %v1210_v49, %v3336_v5  ;;  %v1724_v51 = vpop.f32.mrb[26].mxu0  ;;  %v1212_v52 = vpop.f32.mrb[27].mxu1 }
 0x246   : > { %1862 = vst [vmem:[%s3343_s8 + $0xc8] sm:$0xff] %v2376_v48  ;;  %v2379_v53 = vadd.f32 %v1212_v52, %v3338_v6  ;;  %v1726_v54 = vpop.f32.mrb[27].mxu0 }
 0x247   : > { %v2378_v55 = vadd.f32 %v2377_v50, %v1724_v51 }
 0x248   : > { %v2380_v56 = vadd.f32 %v2379_v53, %v1726_v54  ;;  %v1216_v57 = vpop.f32.mrb[28].mxu1 }
 0x249   : > { %1863 = vst [vmem:[%s3343_s8 + $0xd0] sm:$0xff] %v2378_v55  ;;  %v2381_v58 = vadd.f32 %v1216_v57, %v3336_v5  ;;  %v1730_v59 = vpop.f32.mrb[28].mxu0  ;;  %v1218_v60 = vpop.f32.mrb[29].mxu1 }
 0x24a   : > { %1864 = vst [vmem:[%s3343_s8 + $0xd8] sm:$0xff] %v2380_v56  ;;  %v2383_v61 = vadd.f32 %v1218_v60, %v3338_v6  ;;  %v1732_v62 = vpop.f32.mrb[29].mxu0 }
 0x24b   : > { %v2382_v63 = vadd.f32 %v2381_v58, %v1730_v59 }
 0x24c   : > { %v2384_v0 = vadd.f32 %v2383_v61, %v1732_v62  ;;  %v1222_v1 = vpop.f32.mrb[30].mxu1 }
 0x24d   : > { %1865 = vst [vmem:[%s3343_s8 + $0xe0] sm:$0xff] %v2382_v63  ;;  %v2385_v2 = vadd.f32 %v1222_v1, %v3336_v5  ;;  %v1736_v3 = vpop.f32.mrb[30].mxu0  ;;  %v1224_v4 = vpop.f32.mrb[31].mxu1 }
 0x24e   : > { %1866 = vst [vmem:[%s3343_s8 + $0xe8] sm:$0xff] %v2384_v0  ;;  %v2387_v7 = vadd.f32 %v1224_v4, %v3338_v6  ;;  %v1738_v8 = vpop.f32.mrb[31].mxu0 }
 0x24f   : > { %v2386_v9 = vadd.f32 %v2385_v2, %v1736_v3 }
 0x250   : > { %v2388_v10 = vadd.f32 %v2387_v7, %v1738_v8  ;;  %v1228_v11 = vpop.f32.mrb[32].mxu1 }
 0x251   : > { %1867 = vst [vmem:[%s3343_s8 + $0xf0] sm:$0xff] %v2386_v9  ;;  %v2389_v12 = vadd.f32 %v1228_v11, %v3336_v5  ;;  %v1742_v13 = vpop.f32.mrb[32].mxu0  ;;  %v1230_v14 = vpop.f32.mrb[33].mxu1 }
 0x252   : > { %1868 = vst [vmem:[%s3343_s8 + $0xf8] sm:$0xff] %v2388_v10  ;;  %v2391_v15 = vadd.f32 %v1230_v14, %v3338_v6  ;;  %v1744_v16 = vpop.f32.mrb[33].mxu0 }
 0x253   : > { %v2390_v17 = vadd.f32 %v2389_v12, %v1742_v13 }
 0x254   : > { %v2392_v18 = vadd.f32 %v2391_v15, %v1744_v16  ;;  %v1234_v19 = vpop.f32.mrb[34].mxu1 }
 0x255   : > { %1869 = vst [vmem:[%s3343_s8 + $0x100] sm:$0xff] %v2390_v17  ;;  %v2393_v20 = vadd.f32 %v1234_v19, %v3336_v5  ;;  %v1748_v21 = vpop.f32.mrb[34].mxu0  ;;  %v1236_v22 = vpop.f32.mrb[35].mxu1 }
 0x256   : > { %1870 = vst [vmem:[%s3343_s8 + $0x108] sm:$0xff] %v2392_v18  ;;  %v2395_v23 = vadd.f32 %v1236_v22, %v3338_v6  ;;  %v1750_v24 = vpop.f32.mrb[35].mxu0 }
 0x257   : > { %v2394_v25 = vadd.f32 %v2393_v20, %v1748_v21 }
 0x258   : > { %v2396_v26 = vadd.f32 %v2395_v23, %v1750_v24  ;;  %v1240_v27 = vpop.f32.mrb[36].mxu1 }
 0x259   : > { %1871 = vst [vmem:[%s3343_s8 + $0x110] sm:$0xff] %v2394_v25  ;;  %v2397_v28 = vadd.f32 %v1240_v27, %v3336_v5  ;;  %v1754_v29 = vpop.f32.mrb[36].mxu0  ;;  %v1242_v30 = vpop.f32.mrb[37].mxu1 }
 0x25a   : > { %1872 = vst [vmem:[%s3343_s8 + $0x118] sm:$0xff] %v2396_v26  ;;  %v2399_v31 = vadd.f32 %v1242_v30, %v3338_v6  ;;  %v1756_v32 = vpop.f32.mrb[37].mxu0 }
 0x25b   : > { %v2398_v33 = vadd.f32 %v2397_v28, %v1754_v29 }
 0x25c   : > { %v2400_v34 = vadd.f32 %v2399_v31, %v1756_v32  ;;  %v1246_v35 = vpop.f32.mrb[38].mxu1 }
 0x25d   : > { %1873 = vst [vmem:[%s3343_s8 + $0x120] sm:$0xff] %v2398_v33  ;;  %v2401_v36 = vadd.f32 %v1246_v35, %v3336_v5  ;;  %v1760_v37 = vpop.f32.mrb[38].mxu0  ;;  %v1248_v38 = vpop.f32.mrb[39].mxu1 }
 0x25e   : > { %1874 = vst [vmem:[%s3343_s8 + $0x128] sm:$0xff] %v2400_v34  ;;  %v2403_v39 = vadd.f32 %v1248_v38, %v3338_v6  ;;  %v1762_v40 = vpop.f32.mrb[39].mxu0 }
 0x25f   : > { %v2402_v41 = vadd.f32 %v2401_v36, %v1760_v37 }
 0x260   : > { %v2404_v42 = vadd.f32 %v2403_v39, %v1762_v40  ;;  %v1252_v43 = vpop.f32.mrb[40].mxu1 }
 0x261   : > { %1875 = vst [vmem:[%s3343_s8 + $0x130] sm:$0xff] %v2402_v41  ;;  %v2405_v44 = vadd.f32 %v1252_v43, %v3336_v5  ;;  %v1766_v45 = vpop.f32.mrb[40].mxu0  ;;  %v1254_v46 = vpop.f32.mrb[41].mxu1 }
 0x262   : > { %1876 = vst [vmem:[%s3343_s8 + $0x138] sm:$0xff] %v2404_v42  ;;  %v2407_v47 = vadd.f32 %v1254_v46, %v3338_v6  ;;  %v1768_v48 = vpop.f32.mrb[41].mxu0 }
 0x263   : > { %v2406_v49 = vadd.f32 %v2405_v44, %v1766_v45 }
 0x264   : > { %v2408_v50 = vadd.f32 %v2407_v47, %v1768_v48  ;;  %v1258_v51 = vpop.f32.mrb[42].mxu1 }
 0x265   : > { %1877 = vst [vmem:[%s3343_s8 + $0x140] sm:$0xff] %v2406_v49  ;;  %v2409_v52 = vadd.f32 %v1258_v51, %v3336_v5  ;;  %v1772_v53 = vpop.f32.mrb[42].mxu0  ;;  %v1260_v54 = vpop.f32.mrb[43].mxu1 }
 0x266   : > { %1878 = vst [vmem:[%s3343_s8 + $0x148] sm:$0xff] %v2408_v50  ;;  %v2411_v55 = vadd.f32 %v1260_v54, %v3338_v6  ;;  %v1774_v56 = vpop.f32.mrb[43].mxu0 }
 0x267   : > { %v2410_v57 = vadd.f32 %v2409_v52, %v1772_v53 }
 0x268   : > { %v2412_v58 = vadd.f32 %v2411_v55, %v1774_v56  ;;  %v1264_v59 = vpop.f32.mrb[44].mxu1 }
 0x269   : > { %1879 = vst [vmem:[%s3343_s8 + $0x150] sm:$0xff] %v2410_v57  ;;  %v2413_v60 = vadd.f32 %v1264_v59, %v3336_v5  ;;  %v1778_v61 = vpop.f32.mrb[44].mxu0  ;;  %v1266_v62 = vpop.f32.mrb[45].mxu1 }
 0x26a   : > { %1880 = vst [vmem:[%s3343_s8 + $0x158] sm:$0xff] %v2412_v58  ;;  %v2415_v63 = vadd.f32 %v1266_v62, %v3338_v6  ;;  %v1780_v0 = vpop.f32.mrb[45].mxu0 }
 0x26b   : > { %v2414_v1 = vadd.f32 %v2413_v60, %v1778_v61 }
 0x26c   : > { %v2416_v2 = vadd.f32 %v2415_v63, %v1780_v0  ;;  %v1270_v3 = vpop.f32.mrb[46].mxu1 }
 0x26d   : > { %1881 = vst [vmem:[%s3343_s8 + $0x160] sm:$0xff] %v2414_v1  ;;  %v2417_v4 = vadd.f32 %v1270_v3, %v3336_v5  ;;  %v1784_v7 = vpop.f32.mrb[46].mxu0  ;;  %v1272_v8 = vpop.f32.mrb[47].mxu1 }
 0x26e   : > { %1882 = vst [vmem:[%s3343_s8 + $0x168] sm:$0xff] %v2416_v2  ;;  %v2419_v9 = vadd.f32 %v1272_v8, %v3338_v6  ;;  %v1786_v10 = vpop.f32.mrb[47].mxu0 }
 0x26f   : > { %v2418_v11 = vadd.f32 %v2417_v4, %v1784_v7 }
 0x270   : > { %v2420_v12 = vadd.f32 %v2419_v9, %v1786_v10  ;;  %v1276_v13 = vpop.f32.mrb[48].mxu1 }
 0x271   : > { %1883 = vst [vmem:[%s3343_s8 + $0x170] sm:$0xff] %v2418_v11  ;;  %v2421_v14 = vadd.f32 %v1276_v13, %v3336_v5  ;;  %v1790_v15 = vpop.f32.mrb[48].mxu0  ;;  %v1278_v16 = vpop.f32.mrb[49].mxu1 }
 0x272   : > { %1884 = vst [vmem:[%s3343_s8 + $0x178] sm:$0xff] %v2420_v12  ;;  %v2423_v17 = vadd.f32 %v1278_v16, %v3338_v6  ;;  %v1792_v18 = vpop.f32.mrb[49].mxu0 }
 0x273   : > { %v2422_v19 = vadd.f32 %v2421_v14, %v1790_v15 }
 0x274   : > { %v2424_v20 = vadd.f32 %v2423_v17, %v1792_v18  ;;  %v1282_v21 = vpop.f32.mrb[50].mxu1 }
 0x275   : > { %1885 = vst [vmem:[%s3343_s8 + $0x180] sm:$0xff] %v2422_v19  ;;  %v2425_v22 = vadd.f32 %v1282_v21, %v3336_v5  ;;  %v1796_v23 = vpop.f32.mrb[50].mxu0  ;;  %v1284_v24 = vpop.f32.mrb[51].mxu1 }
 0x276   : > { %1886 = vst [vmem:[%s3343_s8 + $0x188] sm:$0xff] %v2424_v20  ;;  %v2427_v25 = vadd.f32 %v1284_v24, %v3338_v6  ;;  %v1798_v26 = vpop.f32.mrb[51].mxu0 }
 0x277   : > { %v2426_v27 = vadd.f32 %v2425_v22, %v1796_v23 }
 0x278   : > { %v2428_v28 = vadd.f32 %v2427_v25, %v1798_v26  ;;  %v1288_v29 = vpop.f32.mrb[52].mxu1 }
 0x279   : > { %1887 = vst [vmem:[%s3343_s8 + $0x190] sm:$0xff] %v2426_v27  ;;  %v2429_v30 = vadd.f32 %v1288_v29, %v3336_v5  ;;  %v1802_v31 = vpop.f32.mrb[52].mxu0  ;;  %v1290_v32 = vpop.f32.mrb[53].mxu1 }
 0x27a   : > { %1888 = vst [vmem:[%s3343_s8 + $0x198] sm:$0xff] %v2428_v28  ;;  %v2431_v33 = vadd.f32 %v1290_v32, %v3338_v6  ;;  %v1804_v34 = vpop.f32.mrb[53].mxu0 }
 0x27b   : > { %v2430_v35 = vadd.f32 %v2429_v30, %v1802_v31 }
 0x27c   : > { %v2432_v36 = vadd.f32 %v2431_v33, %v1804_v34  ;;  %v1294_v37 = vpop.f32.mrb[54].mxu1 }
 0x27d   : > { %1889 = vst [vmem:[%s3343_s8 + $0x1a0] sm:$0xff] %v2430_v35  ;;  %v2433_v38 = vadd.f32 %v1294_v37, %v3336_v5  ;;  %v1808_v39 = vpop.f32.mrb[54].mxu0  ;;  %v1296_v40 = vpop.f32.mrb[55].mxu1 }
 0x27e   : > { %1890 = vst [vmem:[%s3343_s8 + $0x1a8] sm:$0xff] %v2432_v36  ;;  %v2435_v41 = vadd.f32 %v1296_v40, %v3338_v6  ;;  %v1810_v42 = vpop.f32.mrb[55].mxu0 }
 0x27f   : > { %v2434_v43 = vadd.f32 %v2433_v38, %v1808_v39 }
 0x280   : > { %v2436_v44 = vadd.f32 %v2435_v41, %v1810_v42  ;;  %v1300_v45 = vpop.f32.mrb[56].mxu1 }
 0x281   : > { %1891 = vst [vmem:[%s3343_s8 + $0x1b0] sm:$0xff] %v2434_v43  ;;  %v2437_v46 = vadd.f32 %v1300_v45, %v3336_v5  ;;  %v1814_v47 = vpop.f32.mrb[56].mxu0  ;;  %v1302_v48 = vpop.f32.mrb[57].mxu1 }
 0x282   : > { %1892 = vst [vmem:[%s3343_s8 + $0x1b8] sm:$0xff] %v2436_v44  ;;  %v2439_v49 = vadd.f32 %v1302_v48, %v3338_v6  ;;  %v1816_v50 = vpop.f32.mrb[57].mxu0 }
 0x283   : > { %v2438_v51 = vadd.f32 %v2437_v46, %v1814_v47 }
 0x284   : > { %v2440_v52 = vadd.f32 %v2439_v49, %v1816_v50  ;;  %v1306_v53 = vpop.f32.mrb[58].mxu1 }
 0x285   : > { %1893 = vst [vmem:[%s3343_s8 + $0x1c0] sm:$0xff] %v2438_v51  ;;  %v2441_v54 = vadd.f32 %v1306_v53, %v3336_v5  ;;  %v1820_v55 = vpop.f32.mrb[58].mxu0  ;;  %v1308_v56 = vpop.f32.mrb[59].mxu1 }
 0x286   : > { %1894 = vst [vmem:[%s3343_s8 + $0x1c8] sm:$0xff] %v2440_v52  ;;  %v2443_v57 = vadd.f32 %v1308_v56, %v3338_v6  ;;  %v1822_v58 = vpop.f32.mrb[59].mxu0 }
 0x287   : > { %v2442_v59 = vadd.f32 %v2441_v54, %v1820_v55 }
 0x288   : > { %v2444_v60 = vadd.f32 %v2443_v57, %v1822_v58  ;;  %v1312_v61 = vpop.f32.mrb[60].mxu1 }
 0x289   : > { %1895 = vst [vmem:[%s3343_s8 + $0x1d0] sm:$0xff] %v2442_v59  ;;  %v2445_v62 = vadd.f32 %v1312_v61, %v3336_v5  ;;  %v1826_v63 = vpop.f32.mrb[60].mxu0  ;;  %v1314_v0 = vpop.f32.mrb[61].mxu1 }
 0x28a   : > { %1896 = vst [vmem:[%s3343_s8 + $0x1d8] sm:$0xff] %v2444_v60  ;;  %v2447_v1 = vadd.f32 %v1314_v0, %v3338_v6  ;;  %v1828_v2 = vpop.f32.mrb[61].mxu0 }
 0x28b   : > { %v2446_v3 = vadd.f32 %v2445_v62, %v1826_v63 }
 0x28c   : > { %v2448_v4 = vadd.f32 %v2447_v1, %v1828_v2  ;;  %v1318_v7 = vpop.f32.mrb[62].mxu1 }
 0x28d   : > { %1897 = vst [vmem:[%s3343_s8 + $0x1e0] sm:$0xff] %v2446_v3  ;;  %v2449_v8 = vadd.f32 %v1318_v7, %v3336_v5  ;;  %v1832_v9 = vpop.f32.mrb[62].mxu0  ;;  %v1320_v10 = vpop.f32.mrb[63].mxu1 }
 0x28e   : > { %1898 = vst [vmem:[%s3343_s8 + $0x1e8] sm:$0xff] %v2448_v4  ;;  %v2451_v11 = vadd.f32 %v1320_v10, %v3338_v6  ;;  %v1834_v12 = vpop.f32.mrb[63].mxu0 }
 0x28f   : > { %v2450_v13 = vadd.f32 %v2449_v8, %v1832_v9 }
 0x290   : > { %v2452_v14 = vadd.f32 %v2451_v11, %v1834_v12 }
 0x291   : > { %1899 = vst [vmem:[%s3343_s8 + $0x1f0] sm:$0xff] %v2450_v13 }
 0x292   : > { %1900 = vst [vmem:[%s3343_s8 + $0x1f8] sm:$0xff] %v2452_v14 }
 0x293   : > { %2768 = shalt.err (!%p2765_p8)
}
 0x294   : > { %s2769_s18 = scalar_lea.hbm %s3474_s23, 8192  ;;  %s2773_s6 = scalar_lea.hbm %s3530_s3, 16384 }
 0x295   : > { %p2770_p10 = scmp.ne.s32.totalorder %s3474_s23, %s2769_s18  ;;  %p2774_p3 = scmp.lt.u32.totalorder %s3474_s23, %s3530_s3 }
 0x296   : > { %p2775_p2 = scmp.lt.u32.totalorder %s2773_s6, %s2769_s18  ;;  %p2777_p4 = scmp.lt.u32.totalorder %s2769_s18, %s3474_s23 }
 0x297   : > { %p2771_p13 = pnand %p2770_p10, %p3555_p6 }
 0x298   : > { %p2776_p11 = por %p2775_p2, %p2774_p3 }
 0x299   : > { %p2772_p7 = pneg %p2771_p13 }
 0x29a   : > { %p2778_p1 = por %p2777_p4, %p2776_p11 }
 0x29c   : > { %p2779_p12 = pnand %p2778_p1, %p2772_p7 }
 0x29e   : > { %2782 = shalt.err (!%p2779_p12)
}
 0x29f   : > { %s2852_s30 = smov 256   ;;  %s2853_s7 = smov 512  }
 0x2a0   : > { %s2854_s8 = smov 16  }
 0x2a1   : > { %2589 = dma.vmem_to_hbm [thread:$0]  (%p3555_p6), %s3476_s27, 8192, %s3474_s23, %s1902_s15, %s2852_s30, %s2853_s7, %s2854_s8  }
 0x2a2 PF: > { %s1933_s25 = sand.u32 1, %s2821_s12   ;;  %p3556_p0 = scmp.ne.s32.totalorder %s3545_s4, 0 }
 0x2a3   : > { %p3557_p9 = scmp.ge.s32.totalorder %s2841_s17, 2  ;;  %s1934_s22 = scalar_lea.sflag [#allocation4], %s1933_s25 }
 0x2a5   : > { %p2603_p5 = pnand %p3557_p9, %p3556_p0 }
 0x2a7   : > { %2816 = dma.done.wait (!%p2603_p5), %s1934_s22, 8192  }
 0x2a8   : > { %2818 = vsyncadd (!%p2603_p5), %s1934_s22, 4294959104  ;;  %s20_s17 = sadd.s32 1, %s2841_s17   ;;  %s3558_s28 = sld [smem:[#allocation12_spill]] }
 0x2a9   : > { %p17_p8 = scmp.ge.s32.totalorder %s20_s17, 4   ;;  %s3559_s12 = smov %s2825_s13 }
 0x2aa   : > { %s3560_s13 = smov %s2829_s14  ;;  %s3561_s14 = smov %s2923_s24 }
 0x2ab   : > { %s3562_s15 = smov %s2837_s16  ;;  %19 = sbr.rel (!%p17_p8) target bundleno = 9 (0x9), region = 94 }
 0x2ae   : > { %s3563_s16 = smov %s3558_s28 }
 0x2b2   :  { %1939 = vsyncpa [#allocation3], 1 }
 0x2b3   :  { %1941 = vsyncpa [#allocation3 + $0x1], 1 }
 0x2b4   :  { %1942 = vsyncpa [#allocation6], 1 }
 0x2b5   :  { %1944 = vsyncpa [#allocation6 + $0x1], 1 }
 0x2b6   :  { %1945 = vsyncpa [#allocation4], 1 }
 0x2b7   :  { %1947 = vsyncpa [#allocation4 + $0x1], 1 }

</bundles_post_ra>
